<compile_context>
chip_gen: v7x
topology: tpu7x:2x2x1
jax: 0.10.0
libtpu: 0.0.40
codegen_flags: <defaults>
</compile_context>

<pallas_src>
import jax
import jax.numpy as jnp
from jax.experimental import pallas as pl
from jax.experimental.pallas import tpu as pltpu

# ---- problem dimensions implied by the PyTorch module ----
IN_H = IN_W = 28
IN_PIX = IN_H * IN_W              # 784
KH = KW = 7
STRIDE = 3
OH = OW = 8                       # (28 - 7) // 3 + 1
CONV_OUT_C = 4
CONV_FLAT = CONV_OUT_C * OH * OW  # 256
HIDDEN = 64
OUTPUT = 10

# ---- lane-padded sizes (multiples of 128) ----
K_PAD = 896                       # 784 -> 896 (7 * 128)
H_PAD = 128
OUT_PAD = 128

# Default batch-tile rows per grid step (tunable).  With the dense 896-lane
# images, a 1024-row tile is ~8 MiB (bf16) / ~12 MiB (f32) of per-step VMEM
# including double buffers -- fits every generation (v5e/v6e 128 MiB, v7x 64 MiB).
TILE_M = 1024


def _round_up(x, m):
    return ((x + m - 1) // m) * m


def _vmem_limit_bytes():
    """Generation-aware scoped-VMEM limit: ~75% of physical VMEM.

    ~48 MiB on v7x (64 MiB physical), ~96 MiB on v5e/v6e (128 MiB physical),
    capped at 100 MiB; conservative 48 MiB fallback if the query is unavailable.
    """
    try:
        phys = int(pltpu.get_tpu_info().vmem_capacity_bytes)
        return int(min(phys * 3 // 4, 100 * 1024 * 1024))
    except Exception:
        return 48 * 1024 * 1024


def lenet_kernel(img_ref, wc_ref, bc_ref, w1_ref, b1_ref, w2_ref, b2_ref,
                 out_ref):
    # img_ref: (tile_m, K_PAD)        wc_ref: (K_PAD, 256)   bc_ref: (1, 256)
    # w1_ref:  (256, H_PAD)           b1_ref: (1, H_PAD)
    # w2_ref:  (H_PAD, OUT_PAD)       b2_ref: (1, OUT_PAD)
    # out_ref: (tile_m, OUT_PAD)

    # conv1 + bias as one dense matmul over raw flattened pixels; the weight's
    # column order already gives PyTorch's channel-major .view(-1, 256) layout.
    conv = jnp.dot(img_ref[...], wc_ref[...],
                   preferred_element_type=jnp.float32)
    conv = conv + bc_ref[...]
    conv = conv * conv                               # square activation (f32 VPU)

    # fc1 + square.  Activations stay f32 (accuracy); weights cast up if bf16.
    # These matmuls are tiny and fully hidden under the conv matmul / image DMA.
    h = jnp.dot(conv, w1_ref[...].astype(jnp.float32),
                preferred_element_type=jnp.float32)
    h = h + b1_ref[...]
    h = h * h                                        # square activation (f32 VPU)

    # fc2
    out = jnp.dot(h, w2_ref[...].astype(jnp.float32),
                  preferred_element_type=jnp.float32)
    out_ref[...] = (out + b2_ref[...]).astype(out_ref.dtype)


def _prep_params(Wc, bc, W1, b1, W2, b2, param_dtype):
    """PyTorch-shaped params -> lane-padded kernel operands."""
    # Dense conv-as-matmul weight on raw flattened pixels:
    #   W_dense[(oh*3+kh)*28 + (ow*3+kw), c*64 + oh*8 + ow] = Wc[c, 0, kh, kw]
    # (49 non-zeros per column; every (row, col) pair is unique).
    c_i, oh_i, ow_i, kh_i, kw_i = jnp.meshgrid(
        jnp.arange(CONV_OUT_C), jnp.arange(OH), jnp.arange(OW),
        jnp.arange(KH), jnp.arange(KW), indexing="ij")
    rows = (oh_i * STRIDE + kh_i) * IN_W + (ow_i * STRIDE + kw_i)
    cols = c_i * (OH * OW) + oh_i * OW + ow_i
    vals = Wc.astype(jnp.float32)[c_i, 0, kh_i, kw_i]
    w_dense = (jnp.zeros((IN_PIX, CONV_FLAT), jnp.float32)
               .at[rows.ravel(), cols.ravel()].set(vals.ravel()))
    w_dense = jnp.pad(w_dense, ((0, K_PAD - IN_PIX), (0, 0))).astype(param_dtype)

    # bias broadcast matching the c*64 + p column order
    bc_flat = jnp.repeat(bc.astype(jnp.float32), OH * OW).reshape(1, CONV_FLAT)

    w1 = jnp.pad(W1.T.astype(jnp.float32),
                 ((0, 0), (0, H_PAD - HIDDEN))).astype(param_dtype)      # (256, 128)
    b1p = jnp.pad(b1.astype(jnp.float32), (0, H_PAD - HIDDEN)).reshape(1, H_PAD)
    w2 = jnp.pad(W2.T.astype(jnp.float32),
                 ((0, H_PAD - HIDDEN), (0, OUT_PAD - OUTPUT))).astype(param_dtype)
    b2p = jnp.pad(b2.astype(jnp.float32), (0, OUT_PAD - OUTPUT)).reshape(1, OUT_PAD)
    return w_dense, bc_flat, w1, b1p, w2, b2p


def lenet_pallas(x, Wc, bc, W1, b1, W2, b2, *, param_dtype=jnp.bfloat16,
                 tile_m=TILE_M):
    """Forward pass.  x: (B, 1, 28, 28); params PyTorch-shaped (OIHW / (out, in))."""
    batch = x.shape[0]

    # Batch tiling: tile is a multiple of 128; shrink for small batches and
    # prefer >= 2 grid steps when there is enough work (v7x has 2 TensorCores
    # and the "parallel" axis is how work is sharded across them).
    tile_m = _round_up(max(int(tile_m), 128), 128)
    b128 = _round_up(batch, 128)
    tile = min(tile_m, b128)
    if b128 >= 256:
        tile = min(tile, _round_up(b128 // 2, 128))
    b_pad = _round_up(b128, tile)
    n_tiles = b_pad // tile

    # Raw flattened images, zero-padded to 896 lanes (no im2col inflation).
    imgs = x.astype(jnp.float32).reshape(batch, IN_PIX)
    imgs = jnp.pad(imgs, ((0, b_pad - batch), (0, K_PAD - IN_PIX))).astype(param_dtype)

    w_dense, bc_flat, w1, b1p, w2, b2p = _prep_params(Wc, bc, W1, b1, W2, b2,
                                                      param_dtype)

    itemsize = jnp.dtype(param_dtype).itemsize
    flops = (2 * b_pad * (K_PAD * CONV_FLAT + CONV_FLAT * H_PAD + H_PAD * OUT_PAD)
             + 2 * b_pad * (CONV_FLAT + H_PAD))
    bytes_accessed = ((imgs.size + w_dense.size + w1.size + w2.size) * itemsize
                      + (bc_flat.size + b1p.size + b2p.size) * 4
                      + b_pad * OUT_PAD * 4)

    out = pl.pallas_call(
        lenet_kernel,
        out_shape=jax.ShapeDtypeStruct((b_pad, OUT_PAD), jnp.float32),
        grid=(n_tiles,),
        in_specs=[
            pl.BlockSpec((tile, K_PAD), lambda i: (i, 0)),        # batch-tiled images
            pl.BlockSpec((K_PAD, CONV_FLAT), lambda i: (0, 0)),   # VMEM-resident weights
            pl.BlockSpec((1, CONV_FLAT), lambda i: (0, 0)),
            pl.BlockSpec((CONV_FLAT, H_PAD), lambda i: (0, 0)),
            pl.BlockSpec((1, H_PAD), lambda i: (0, 0)),
            pl.BlockSpec((H_PAD, OUT_PAD), lambda i: (0, 0)),
            pl.BlockSpec((1, OUT_PAD), lambda i: (0, 0)),
        ],
        out_specs=pl.BlockSpec((tile, OUT_PAD), lambda i: (i, 0)),
        compiler_params=pltpu.CompilerParams(
            dimension_semantics=("parallel",),     # shard batch across TCs on v7x
            vmem_limit_bytes=_vmem_limit_bytes(),
        ),
        cost_estimate=pl.CostEstimate(flops=flops, transcendentals=0,
                                      bytes_accessed=bytes_accessed),
    )(imgs, w_dense, bc_flat, w1, b1p, w2, b2p)

    return out[:batch, :OUTPUT]


def lenet_ref(x, Wc, bc, W1, b1, W2, b2):
    """Pure-JAX reference replicating the PyTorch forward exactly."""
    conv = jax.lax.conv_general_dilated(
        x, Wc, window_strides=(STRIDE, STRIDE), padding="VALID",
        dimension_numbers=("NCHW", "OIHW", "NCHW"))
    conv = conv + bc.reshape(1, -1, 1, 1)
    conv = conv * conv
    xf = conv.reshape(x.shape[0], CONV_FLAT)   # channel-major flatten == .view(-1, 256)
    h = xf @ W1.T + b1
    h = h * h
    return h @ W2.T + b2


if __name__ == "__main__":
    key = jax.random.PRNGKey(0)
    k = jax.random.split(key, 8)

    B = 2
    # deterministic synthetic parameters (PyTorch shapes)
    Wc = 0.1 * jax.random.normal(k[0], (CONV_OUT_C, 1, KH, KW), jnp.float32)
    bc = 0.1 * jax.random.normal(k[1], (CONV_OUT_C,), jnp.float32)
    W1 = 0.05 * jax.random.normal(k[2], (HIDDEN, CONV_FLAT), jnp.float32)
    b1 = 0.05 * jax.random.normal(k[3], (HIDDEN,), jnp.float32)
    W2 = 0.05 * jax.random.normal(k[4], (OUTPUT, HIDDEN), jnp.float32)
    b2 = 0.05 * jax.random.normal(k[5], (OUTPUT,), jnp.float32)

    # input: NCHW, 28x28 (required by view(-1, 256))
    x = jax.random.normal(k[6], (B, 1, IN_H, IN_W), jnp.float32)

    ref = lenet_ref(x, Wc, bc, W1, b1, W2, b2)

    # f32 operands: matches the f32 reference tightly.
    out_f32 = jax.block_until_ready(
        lenet_pallas(x, Wc, bc, W1, b1, W2, b2, param_dtype=jnp.float32))
    assert out_f32.shape == (B, OUTPUT)
    assert jnp.allclose(out_f32, ref, atol=5e-4, rtol=5e-4), "f32 mismatch vs reference"

    # default path: bf16 image/weight operands (HBM/VMEM-bytes + MXU-rate
    # optimization for v6e/v7x); activations, squares and accumulation stay f32.
    out_bf16 = jax.block_until_ready(lenet_pallas(x, Wc, bc, W1, b1, W2, b2))
    assert out_bf16.shape == (B, OUTPUT)
    assert jnp.allclose(out_bf16, ref, atol=5e-2, rtol=1e-1), "bf16 mismatch vs reference"

    print("KERNEL_OK")
</pallas_src>

<mosaic_0001>
module attributes {stable_mosaic.version = 11 : i64} {
  func.func @lenet_kernel(%arg0: i32, %arg1: memref<128x896xf32, #tpu.memory_space<vmem>>, %arg2: memref<896x256xf32, #tpu.memory_space<vmem>>, %arg3: memref<1x256xf32, #tpu.memory_space<vmem>>, %arg4: memref<256x128xf32, #tpu.memory_space<vmem>>, %arg5: memref<1x128xf32, #tpu.memory_space<vmem>>, %arg6: memref<128x128xf32, #tpu.memory_space<vmem>>, %arg7: memref<1x128xf32, #tpu.memory_space<vmem>>, %arg8: memref<128x128xf32, #tpu.memory_space<vmem>>) attributes {dimension_semantics = [#tpu.dimension_semantics<parallel>], iteration_bounds = array<i64: 1>, scalar_prefetch = 0 : i64, scratch_operands = 0 : i64, tpu.core_type = #tpu.core_type<tc>, window_params = [{transform_indices = @transform_0, window_bounds = array<i64: 128, 896>}, {pipeline_mode = #tpu.pipeline_mode<synchronous>, transform_indices = @transform_1, window_bounds = array<i64: 896, 256>}, {pipeline_mode = #tpu.pipeline_mode<synchronous>, transform_indices = @transform_2, window_bounds = array<i64: 1, 256>}, {pipeline_mode = #tpu.pipeline_mode<synchronous>, transform_indices = @transform_3, window_bounds = array<i64: 256, 128>}, {pipeline_mode = #tpu.pipeline_mode<synchronous>, transform_indices = @transform_4, window_bounds = array<i64: 1, 128>}, {pipeline_mode = #tpu.pipeline_mode<synchronous>, transform_indices = @transform_5, window_bounds = array<i64: 128, 128>}, {pipeline_mode = #tpu.pipeline_mode<synchronous>, transform_indices = @transform_6, window_bounds = array<i64: 1, 128>}, {transform_indices = @transform_7, window_bounds = array<i64: 128, 128>}]} {
    %c0 = arith.constant 0 : index
    %c0_0 = arith.constant 0 : index
    %0 = vector.load %arg1[%c0, %c0_0] : memref<128x896xf32, #tpu.memory_space<vmem>>, vector<128x896xf32>
    %c0_1 = arith.constant 0 : index
    %c0_2 = arith.constant 0 : index
    %1 = vector.load %arg2[%c0_1, %c0_2] : memref<896x256xf32, #tpu.memory_space<vmem>>, vector<896x256xf32>
    %cst = arith.constant dense<0.000000e+00> : vector<128x256xf32>
    %2 = tpu.matmul %0, %1, %cst {dimension_numbers = #tpu.dot_dimension_numbers<[1], [0], [0], [1], [0, 0, 1, 1], [], []>} : vector<128x896xf32>, vector<896x256xf32>, vector<128x256xf32> -> vector<128x256xf32>
    %c0_3 = arith.constant 0 : index
    %c0_4 = arith.constant 0 : index
    %3 = vector.load %arg3[%c0_3, %c0_4] : memref<1x256xf32, #tpu.memory_space<vmem>>, vector<1x256xf32>
    %4 = vector.broadcast %3 : vector<1x256xf32> to vector<128x256xf32>
    %5 = arith.addf %2, %4 : vector<128x256xf32>
    %6 = arith.mulf %5, %5 : vector<128x256xf32>
    %c0_5 = arith.constant 0 : index
    %c0_6 = arith.constant 0 : index
    %7 = vector.load %arg4[%c0_5, %c0_6] : memref<256x128xf32, #tpu.memory_space<vmem>>, vector<256x128xf32>
    %cst_7 = arith.constant dense<0.000000e+00> : vector<128x128xf32>
    %8 = tpu.matmul %6, %7, %cst_7 {dimension_numbers = #tpu.dot_dimension_numbers<[1], [0], [0], [1], [0, 0, 1, 1], [], []>} : vector<128x256xf32>, vector<256x128xf32>, vector<128x128xf32> -> vector<128x128xf32>
    %c0_8 = arith.constant 0 : index
    %c0_9 = arith.constant 0 : index
    %9 = vector.load %arg5[%c0_8, %c0_9] : memref<1x128xf32, #tpu.memory_space<vmem>>, vector<1x128xf32>
    %10 = vector.broadcast %9 : vector<1x128xf32> to vector<128x128xf32>
    %11 = arith.addf %8, %10 : vector<128x128xf32>
    %12 = arith.mulf %11, %11 : vector<128x128xf32>
    %c0_10 = arith.constant 0 : index
    %c0_11 = arith.constant 0 : index
    %13 = vector.load %arg6[%c0_10, %c0_11] : memref<128x128xf32, #tpu.memory_space<vmem>>, vector<128x128xf32>
    %cst_12 = arith.constant dense<0.000000e+00> : vector<128x128xf32>
    %14 = tpu.matmul %12, %13, %cst_12 {dimension_numbers = #tpu.dot_dimension_numbers<[1], [0], [0], [1], [0, 0, 1, 1], [], []>} : vector<128x128xf32>, vector<128x128xf32>, vector<128x128xf32> -> vector<128x128xf32>
    %c0_13 = arith.constant 0 : index
    %c0_14 = arith.constant 0 : index
    %15 = vector.load %arg7[%c0_13, %c0_14] : memref<1x128xf32, #tpu.memory_space<vmem>>, vector<1x128xf32>
    %16 = vector.broadcast %15 : vector<1x128xf32> to vector<128x128xf32>
    %17 = arith.addf %14, %16 : vector<128x128xf32>
    %c0_15 = arith.constant 0 : index
    %c0_16 = arith.constant 0 : index
    %18 = vector.load %arg8[%c0_15, %c0_16] : memref<128x128xf32, #tpu.memory_space<vmem>>, vector<128x128xf32>
    tpu.vector_store %arg8[%c0_15, %c0_16], %17 {strides = array<i32>} : memref<128x128xf32, #tpu.memory_space<vmem>>, vector<128x128xf32>,
    return
  }
  func.func @transform_0(%arg0: i32) -> (i32, i32) {
    %c0_i32 = arith.constant 0 : i32
    %c0_i32_0 = arith.constant 0 : i32
    return %arg0, %c0_i32 : i32, i32
  }
  func.func @transform_1(%arg0: i32) -> (i32, i32) {
    %c0_i32 = arith.constant 0 : i32
    %c0_i32_0 = arith.constant 0 : i32
    %c0_i32_1 = arith.constant 0 : i32
    return %c0_i32, %c0_i32_0 : i32, i32
  }
  func.func @transform_2(%arg0: i32) -> (i32, i32) {
    %c0_i32 = arith.constant 0 : i32
    %c0_i32_0 = arith.constant 0 : i32
    %c0_i32_1 = arith.constant 0 : i32
    return %c0_i32, %c0_i32_0 : i32, i32
  }
  func.func @transform_3(%arg0: i32) -> (i32, i32) {
    %c0_i32 = arith.constant 0 : i32
    %c0_i32_0 = arith.constant 0 : i32
    %c0_i32_1 = arith.constant 0 : i32
    return %c0_i32, %c0_i32_0 : i32, i32
  }
  func.func @transform_4(%arg0: i32) -> (i32, i32) {
    %c0_i32 = arith.constant 0 : i32
    %c0_i32_0 = arith.constant 0 : i32
    %c0_i32_1 = arith.constant 0 : i32
    return %c0_i32, %c0_i32_0 : i32, i32
  }
  func.func @transform_5(%arg0: i32) -> (i32, i32) {
    %c0_i32 = arith.constant 0 : i32
    %c0_i32_0 = arith.constant 0 : i32
    %c0_i32_1 = arith.constant 0 : i32
    return %c0_i32, %c0_i32_0 : i32, i32
  }
  func.func @transform_6(%arg0: i32) -> (i32, i32) {
    %c0_i32 = arith.constant 0 : i32
    %c0_i32_0 = arith.constant 0 : i32
    %c0_i32_1 = arith.constant 0 : i32
    return %c0_i32, %c0_i32_0 : i32, i32
  }
  func.func @transform_7(%arg0: i32) -> (i32, i32) {
    %c0_i32 = arith.constant 0 : i32
    %c0_i32_0 = arith.constant 0 : i32
    return %arg0, %c0_i32 : i32, i32
  }
}

</mosaic_0001>

<bundles_post_ra>
// kernel: tpu_custom_call.1
= control target key start
LH: loop header
LB: loop body
LE: loop exit
PB: predicated region body
PF: predicated region fallthrough
CT: control target
= control target key end

     0   :  { %12 = vsyncpa [#allocation3], 0  ;;  %s2487_s0 = inlined_call_operand.hbm [shape: f32[128,896], index: 0, kind: input, shape index: {}]   ;;  %s2488_s1 = inlined_call_operand.hbm [shape: f32[896,256], index: 1, kind: input, shape index: {}]   ;;  %s2489_s2 = inlined_call_operand.vmem [shape: f32[1,256], index: 2, kind: input, shape index: {}]   ;;  %s2490_s3 = inlined_call_operand.hbm [shape: f32[256,128], index: 3, kind: input, shape index: {}]   ;;  %s2491_s4 = inlined_call_operand.vmem [shape: f32[1,128], index: 4, kind: input, shape index: {}]   ;;  %s2492_s5 = inlined_call_operand.hbm [shape: f32[128,128], index: 5, kind: input, shape index: {}]   ;;  %s2493_s6 = inlined_call_operand.vmem [shape: f32[1,128], index: 6, kind: input, shape index: {}]   ;;  %s2494_s7 = inlined_call_operand.hbm [shape: f32[128,128], index: 7, kind: output, shape index: {}]  }
   0x1   :  { %13 = vsyncpa [#allocation6], 0 }
   0x2   :  { %14 = vsyncpa [#allocation9], 0 }
   0x3   :  { %15 = vsyncpa [#allocation4], 0  ;;  %s2225_s24 = smov [#allocation5]   ;;  %s2107_s28 = scalar_lea.hbm %s2488_s1, 28672 }
   0x4   :  { %s33_s25 = sshll.u32 %s2225_s24, 4  ;;  %p2108_p0 = scmp.ne.s32.totalorder %s2488_s1, %s2107_s28  ;;  %s34_s25 = int_to_ptr.vmem [resolvable:$true] %s33_s25 }
   0x5   :  { %p2111_p1 = scmp.lt.u32.totalorder %s2107_s28, %s2488_s1 }
   0x7   :  { %p2113_p2 = pnand %p2111_p1, %p2108_p0 }
   0x9   :  { %2116 = shalt.err (!%p2113_p2)
}
   0xa   :  { %s2117_s10 = scalar_lea.vmem %s34_s25, 28672  ;;  %p2122_p4 = scmp.lt.s32.totalorder %s34_s25, %s34_s25 }
   0xb   :  { %p2118_p3 = scmp.ne.s32.totalorder %s34_s25, %s2117_s10  ;;  %p2123_p5 = scmp.lt.s32.totalorder %s2117_s10, %s2117_s10 }
   0xd   :  { %p2124_p6 = por %p2123_p5, %p2122_p4 }
   0xf   :  { %p2125_p7 = pnand %p2124_p6, %p2118_p3 }
  0x11   :  { %2128 = shalt.err (!%p2125_p7)
}
  0x12   :  { %s2226_s11 = smov 256   ;;  %s2227_s12 = smov 16  }
  0x13   :  { %39 = dma.hbm_to_vmem [thread:$0]  %s2488_s1, 28672, %s34_s25, [#allocation6], %s2226_s11, %s2226_s11, %s2227_s12  }
  0x14   :  { %s2228_s15 = smov [#allocation2]   ;;  %s2129_s19 = scalar_lea.hbm %s2487_s0, 14336 }
  0x15   :  { %s21_s16 = sshll.u32 %s2228_s15, 4  ;;  %p2130_p8 = scmp.ne.s32.totalorder %s2487_s0, %s2129_s19  ;;  %s22_s16 = int_to_ptr.vmem [resolvable:$true] %s21_s16 }
  0x16   :  { %p2133_p9 = scmp.lt.u32.totalorder %s2129_s19, %s2487_s0 }
  0x18   :  { %p2135_p10 = pnand %p2133_p9, %p2130_p8 }
  0x1a   :  { %2138 = shalt.err (!%p2135_p10)
}
  0x1b   :  { %s2139_s24 = scalar_lea.vmem %s22_s16, 14336  ;;  %p2144_p12 = scmp.lt.s32.totalorder %s22_s16, %s22_s16 }
  0x1c   :  { %p2140_p11 = scmp.ne.s32.totalorder %s22_s16, %s2139_s24  ;;  %p2145_p13 = scmp.lt.s32.totalorder %s2139_s24, %s2139_s24 }
  0x1e   :  { %p2146_p0 = por %p2145_p13, %p2144_p12 }
  0x20   :  { %p2147_p1 = pnand %p2146_p0, %p2140_p11 }
  0x22   :  { %2150 = shalt.err (!%p2147_p1)
}
  0x23   :  { %s2229_s1 = smov 896   ;;  %s2230_s25 = smov 56  }
  0x24   :  { %27 = dma.hbm_to_vmem [thread:$0]  %s2487_s0, 14336, %s22_s16, [#allocation3], %s2229_s1, %s2229_s1, %s2230_s25  }
  0x25   :  { %s2231_s28 = smov [#allocation7]   ;;  %s2151_s9 = scalar_lea.hbm %s2490_s3, 4096 }
  0x26   :  { %s47_s29 = sshll.u32 %s2231_s28, 4  ;;  %p2152_p2 = scmp.ne.s32.totalorder %s2490_s3, %s2151_s9  ;;  %s48_s29 = int_to_ptr.vmem [resolvable:$true] %s47_s29 }
  0x27   :  { %p2155_p3 = scmp.lt.u32.totalorder %s2151_s9, %s2490_s3 }
  0x29   :  { %p2157_p4 = pnand %p2155_p3, %p2152_p2 }
  0x2b   :  { %2160 = shalt.err (!%p2157_p4)
}
  0x2c   :  { %s2161_s14 = scalar_lea.vmem %s48_s29, 4096  ;;  %p2166_p6 = scmp.lt.s32.totalorder %s48_s29, %s48_s29 }
  0x2d   :  { %p2162_p5 = scmp.ne.s32.totalorder %s48_s29, %s2161_s14  ;;  %p2167_p7 = scmp.lt.s32.totalorder %s2161_s14, %s2161_s14 }
  0x2f   :  { %p2168_p8 = por %p2167_p7, %p2166_p6 }
  0x31   :  { %p2169_p9 = pnand %p2168_p8, %p2162_p5 }
  0x33   :  { %2172 = shalt.err (!%p2169_p9)
}
  0x34   :  { %s2232_s0 = smov 128   ;;  %s2233_s15 = smov 8  }
  0x35   :  { %53 = dma.hbm_to_vmem [thread:$0]  %s2490_s3, 4096, %s48_s29, [#allocation6], %s2232_s0, %s2232_s0, %s2233_s15  }
  0x36   :  { %s2234_s18 = smov [#allocation8]   ;;  %s2173_s22 = scalar_lea.hbm %s2492_s5, 2048 }
  0x37   :  { %s61_s19 = sshll.u32 %s2234_s18, 4  ;;  %p2174_p10 = scmp.ne.s32.totalorder %s2492_s5, %s2173_s22  ;;  %s62_s19 = int_to_ptr.vmem [resolvable:$true] %s61_s19 }
  0x38   :  { %p2177_p11 = scmp.lt.u32.totalorder %s2173_s22, %s2492_s5 }
  0x3a   :  { %p2179_p12 = pnand %p2177_p11, %p2174_p10 }
  0x3c   :  { %2182 = shalt.err (!%p2179_p12)
}
  0x3d   :  { %s2183_s26 = scalar_lea.vmem %s62_s19, 2048  ;;  %p2188_p0 = scmp.lt.s32.totalorder %s62_s19, %s62_s19 }
  0x3e   :  { %p2184_p13 = scmp.ne.s32.totalorder %s62_s19, %s2183_s26  ;;  %p2189_p1 = scmp.lt.s32.totalorder %s2183_s26, %s2183_s26 }
  0x40   :  { %p2190_p2 = por %p2189_p1, %p2188_p0 }
  0x42   :  { %p2191_p3 = pnand %p2190_p2, %p2184_p13 }
  0x44   :  { %2194 = shalt.err (!%p2191_p3)
}
  0x45   :  { %67 = dma.hbm_to_vmem [thread:$0]  %s2492_s5, 2048, %s62_s19, [#allocation9], %s2232_s0, %s2232_s0, %s2233_s15  }
  0x46   :  { %2217 = dma.done.wait [#allocation3], 14336  }
  0x47   :  { %2218 = vsyncadd [#allocation3], 4294952960 }
  0x48   :  { %2219 = dma.done.wait [#allocation6], 32768  }
  0x49   :  { %2220 = vsyncadd [#allocation6], 4294934528 }
  0x4a   :  { %2221 = dma.done.wait [#allocation9], 2048  }
  0x4b   :  { %2222 = vsyncadd [#allocation9], 4294965248  ;;  %v259_v0 = vld [vmem:[#allocation5 + $0x208] sm:$0xff]  ;;  %v261_v1 = vld [vmem:[#allocation5 + $0x218] sm:$0xff] }
  0x4c   :  { %v258_v2 = vld [vmem:[#allocation5 + $0x200] sm:$0xff]  ;;  %v1743_v3 = vpack.c.bf16 %v261_v1, %v259_v0  ;;  %v260_v4 = vld [vmem:[#allocation5 + $0x210] sm:$0xff]  ;;  %v263_v5 = vld [vmem:[#allocation5 + $0x228] sm:$0xff] }
  0x4d   :  { %v265_v6 = vld [vmem:[#allocation5 + $0x238] sm:$0xff]  ;;  %v1745_v7 = vpack.c.bf16 %v260_v4, %v258_v2  ;;  %v262_v9 = vld [vmem:[#allocation5 + $0x220] sm:$0xff]  ;;  %v264_v10 = vld [vmem:[#allocation5 + $0x230] sm:$0xff] }
  0x4e   :  { %v1747_v8 = vpack.c.bf16 %v265_v6, %v263_v5  ;;  %v267_v11 = vld [vmem:[#allocation5 + $0x248] sm:$0xff]  ;;  %1744 = vmatprep.subr.bf16.mxu0 %v1743_v3  ;;  %v269_v12 = vld [vmem:[#allocation5 + $0x258] sm:$0xff]  ;;  %v1749_v13 = vpack.c.bf16 %v264_v10, %v262_v9  ;;  %v266_v15 = vld [vmem:[#allocation5 + $0x240] sm:$0xff] }
  0x4f   :  { %1746 = vmatpush1.bf16.msra.mxu0 %v1745_v7  ;;  %v1751_v14 = vpack.c.bf16 %v269_v12, %v267_v11  ;;  %v268_v16 = vld [vmem:[#allocation5 + $0x250] sm:$0xff]  ;;  %v271_v17 = vld [vmem:[#allocation5 + $0x268] sm:$0xff]  ;;  %v273_v18 = vld [vmem:[#allocation5 + $0x278] sm:$0xff] }
  0x50   :  { %1748 = vmatprep.subr.bf16.mxu0 %v1747_v8  ;;  %v1753_v19 = vpack.c.bf16 %v268_v16, %v266_v15  ;;  %v1755_v20 = vpack.c.bf16 %v273_v18, %v271_v17  ;;  %v270_v21 = vld [vmem:[#allocation5 + $0x260] sm:$0xff]  ;;  %v272_v22 = vld [vmem:[#allocation5 + $0x270] sm:$0xff]  ;;  %v275_v23 = vld [vmem:[#allocation5 + $0x288] sm:$0xff] }
  0x51   :  { %v277_v24 = vld [vmem:[#allocation5 + $0x298] sm:$0xff]  ;;  %v1757_v25 = vpack.c.bf16 %v272_v22, %v270_v21  ;;  %v274_v27 = vld [vmem:[#allocation5 + $0x280] sm:$0xff]  ;;  %v276_v28 = vld [vmem:[#allocation5 + $0x290] sm:$0xff] }
  0x52   :  { %v1759_v26 = vpack.c.bf16 %v277_v24, %v275_v23  ;;  %v279_v29 = vld [vmem:[#allocation5 + $0x2a8] sm:$0xff]  ;;  %v281_v30 = vld [vmem:[#allocation5 + $0x2b8] sm:$0xff]  ;;  %v1761_v31 = vpack.c.bf16 %v276_v28, %v274_v27  ;;  %v278_v33 = vld [vmem:[#allocation5 + $0x2a0] sm:$0xff] }
  0x53   :  { %1750 = vmatpush1.bf16.msra.mxu0 %v1749_v13  ;;  %v1763_v32 = vpack.c.bf16 %v281_v30, %v279_v29  ;;  %v280_v34 = vld [vmem:[#allocation5 + $0x2b0] sm:$0xff]  ;;  %v283_v35 = vld [vmem:[#allocation5 + $0x2c8] sm:$0xff]  ;;  %v285_v36 = vld [vmem:[#allocation5 + $0x2d8] sm:$0xff] }
  0x54   :  { %1752 = vmatprep.subr.bf16.mxu0 %v1751_v14  ;;  %v1765_v37 = vpack.c.bf16 %v280_v34, %v278_v33  ;;  %v1767_v38 = vpack.c.bf16 %v285_v36, %v283_v35  ;;  %v282_v39 = vld [vmem:[#allocation5 + $0x2c0] sm:$0xff]  ;;  %v284_v40 = vld [vmem:[#allocation5 + $0x2d0] sm:$0xff]  ;;  %v85_v41 = vld [vmem:[#allocation2 + $0x18] sm:$0xff] }
  0x55   :  { %v287_v42 = vld [vmem:[#allocation5 + $0x2e8] sm:$0xff]  ;;  %v289_v43 = vld [vmem:[#allocation5 + $0x2f8] sm:$0xff]  ;;  %655 = vmatprep.mubr.f32.mxu0 %v85_v41  ;;  %v1769_v44 = vpack.c.bf16 %v284_v40, %v282_v39  ;;  %v286_v46 = vld [vmem:[#allocation5 + $0x2e0] sm:$0xff] }
  0x56   :  { %v1771_v45 = vpack.c.bf16 %v289_v43, %v287_v42  ;;  %v288_v47 = vld [vmem:[#allocation5 + $0x2f0] sm:$0xff]  ;;  %v291_v48 = vld [vmem:[#allocation5 + $0x308] sm:$0xff]  ;;  %v293_v49 = vld [vmem:[#allocation5 + $0x318] sm:$0xff] }
  0x57   :  { %1754 = vmatpush1.bf16.msra.mxu0 %v1753_v19  ;;  %v1773_v50 = vpack.c.bf16 %v288_v47, %v286_v46  ;;  %v1775_v51 = vpack.c.bf16 %v293_v49, %v291_v48  ;;  %v290_v52 = vld [vmem:[#allocation5 + $0x300] sm:$0xff]  ;;  %v292_v53 = vld [vmem:[#allocation5 + $0x310] sm:$0xff]  ;;  %v295_v54 = vld [vmem:[#allocation5 + $0x328] sm:$0xff] }
  0x58   :  { %1756 = vmatprep.subr.bf16.mxu0 %v1755_v20  ;;  %v297_v55 = vld [vmem:[#allocation5 + $0x338] sm:$0xff]  ;;  %v1777_v56 = vpack.c.bf16 %v292_v53, %v290_v52  ;;  %v294_v58 = vld [vmem:[#allocation5 + $0x320] sm:$0xff]  ;;  %v296_v59 = vld [vmem:[#allocation5 + $0x330] sm:$0xff] }
  0x59   :  { %v1779_v57 = vpack.c.bf16 %v297_v55, %v295_v54  ;;  %v299_v60 = vld [vmem:[#allocation5 + $0x348] sm:$0xff]  ;;  %v301_v61 = vld [vmem:[#allocation5 + $0x358] sm:$0xff]  ;;  %v1781_v62 = vpack.c.bf16 %v296_v59, %v294_v58  ;;  %v298_v0 = vld [vmem:[#allocation5 + $0x340] sm:$0xff] }
  0x5a   :  { %v1783_v63 = vpack.c.bf16 %v301_v61, %v299_v60  ;;  %v300_v1 = vld [vmem:[#allocation5 + $0x350] sm:$0xff]  ;;  %v303_v2 = vld [vmem:[#allocation5 + $0x368] sm:$0xff]  ;;  %v305_v3 = vld [vmem:[#allocation5 + $0x378] sm:$0xff] }
  0x5b   :  { %1758 = vmatpush1.bf16.msra.mxu0 %v1757_v25  ;;  %v1785_v4 = vpack.c.bf16 %v300_v1, %v298_v0  ;;  %v1787_v5 = vpack.c.bf16 %v305_v3, %v303_v2  ;;  %v302_v6 = vld [vmem:[#allocation5 + $0x360] sm:$0xff]  ;;  %v304_v7 = vld [vmem:[#allocation5 + $0x370] sm:$0xff]  ;;  %v307_v8 = vld [vmem:[#allocation5 + $0x388] sm:$0xff] }
  0x5c   :  { %1760 = vmatprep.subr.bf16.mxu0 %v1759_v26  ;;  %v309_v9 = vld [vmem:[#allocation5 + $0x398] sm:$0xff]  ;;  %v1789_v10 = vpack.c.bf16 %v304_v7, %v302_v6  ;;  %v306_v12 = vld [vmem:[#allocation5 + $0x380] sm:$0xff]  ;;  %v308_v13 = vld [vmem:[#allocation5 + $0x390] sm:$0xff] }
  0x5d   :  { %v1791_v11 = vpack.c.bf16 %v309_v9, %v307_v8  ;;  %v311_v14 = vld [vmem:[#allocation5 + $0x3a8] sm:$0xff]  ;;  %v313_v15 = vld [vmem:[#allocation5 + $0x3b8] sm:$0xff]  ;;  %v1793_v16 = vpack.c.bf16 %v308_v13, %v306_v12  ;;  %v310_v18 = vld [vmem:[#allocation5 + $0x3a0] sm:$0xff] }
  0x5e   :  { %v1795_v17 = vpack.c.bf16 %v313_v15, %v311_v14  ;;  %v312_v19 = vld [vmem:[#allocation5 + $0x3b0] sm:$0xff]  ;;  %v315_v20 = vld [vmem:[#allocation5 + $0x3c8] sm:$0xff]  ;;  %v317_v21 = vld [vmem:[#allocation5 + $0x3d8] sm:$0xff] }
  0x5f   :  { %1762 = vmatpush1.bf16.msra.mxu0 %v1761_v31  ;;  %v1797_v22 = vpack.c.bf16 %v312_v19, %v310_v18  ;;  %v314_v23 = vld [vmem:[#allocation5 + $0x3c0] sm:$0xff]  ;;  %v316_v24 = vld [vmem:[#allocation5 + $0x3d0] sm:$0xff]  ;;  %v1799_v25 = vpack.c.bf16 %v317_v21, %v315_v20  ;;  %v319_v26 = vld [vmem:[#allocation5 + $0x3e8] sm:$0xff] }
  0x60   :  { %1764 = vmatprep.subr.bf16.mxu0 %v1763_v32  ;;  %v195_v27 = vld [vmem:[#allocation5 + $0x8] sm:$0xff]  ;;  %v197_v28 = vld [vmem:[#allocation5 + $0x18] sm:$0xff]  ;;  %v194_v31 = vld [vmem:[#allocation5] sm:$0xff]  ;;  %v1801_v34 = vpack.c.bf16 %v316_v24, %v314_v23 }
  0x61   :  { %v321_v29 = vld [vmem:[#allocation5 + $0x3f8] sm:$0xff]  ;;  %v1679_v30 = vpack.c.bf16 %v197_v28, %v195_v27  ;;  %v196_v32 = vld [vmem:[#allocation5 + $0x10] sm:$0xff]  ;;  %v318_v35 = vld [vmem:[#allocation5 + $0x3e0] sm:$0xff] }
  0x62   :  { %v1681_v33 = vpack.c.bf16 %v196_v32, %v194_v31  ;;  %v320_v36 = vld [vmem:[#allocation5 + $0x3f0] sm:$0xff]  ;;  %v201_v39 = vld [vmem:[#allocation5 + $0x38] sm:$0xff]  ;;  %v198_v40 = vld [vmem:[#allocation5 + $0x20] sm:$0xff] }
  0x63   :  { %1766 = vmatpush1.bf16.msra.mxu0 %v1765_v37  ;;  %1680 = vmatprep.subr.bf16.mxu1 %v1679_v30  ;;  %v199_v37 = vld [vmem:[#allocation5 + $0x28] sm:$0xff]  ;;  %v200_v41 = vld [vmem:[#allocation5 + $0x30] sm:$0xff]  ;;  %v325_v43 = vld [vmem:[#allocation5 + $0x418] sm:$0xff] }
  0x64   :  { %1768 = vmatprep.subr.bf16.mxu0 %v1767_v38  ;;  %v1803_v38 = vpack.c.bf16 %v321_v29, %v319_v26  ;;  %1682 = vmatpush1.bf16.msra.mxu1 %v1681_v33  ;;  %v323_v42 = vld [vmem:[#allocation5 + $0x408] sm:$0xff]  ;;  %v205_v47 = vld [vmem:[#allocation5 + $0x58] sm:$0xff]  ;;  %v202_v48 = vld [vmem:[#allocation5 + $0x40] sm:$0xff] }
  0x65   :  { %v203_v46 = vld [vmem:[#allocation5 + $0x48] sm:$0xff]  ;;  %v204_v49 = vld [vmem:[#allocation5 + $0x50] sm:$0xff]  ;;  %v1807_v53 = vpack.c.bf16 %v325_v43, %v323_v42  ;;  %v209_v59 = vld [vmem:[#allocation5 + $0x78] sm:$0xff] }
  0x66   :  { %v1687_v52 = vpack.c.bf16 %v205_v47, %v203_v46  ;;  %v324_v54 = vld [vmem:[#allocation5 + $0x410] sm:$0xff]  ;;  %v327_v55 = vld [vmem:[#allocation5 + $0x428] sm:$0xff]  ;;  %v206_v60 = vld [vmem:[#allocation5 + $0x60] sm:$0xff] }
  0x67   :  { %1770 = vmatpush1.bf16.msra.mxu0 %v1769_v44  ;;  %v1683_v44 = vpack.c.bf16 %v201_v39, %v199_v37  ;;  %v207_v58 = vld [vmem:[#allocation5 + $0x68] sm:$0xff]  ;;  %v84_v61 = vld [vmem:[#allocation2 + $0x10] sm:$0xff]  ;;  %v213_v3 = vld [vmem:[#allocation5 + $0x98] sm:$0xff] }
  0x68   :  { %1772 = vmatprep.subr.bf16.mxu0 %v1771_v45  ;;  %v1685_v45 = vpack.c.bf16 %v200_v41, %v198_v40  ;;  %v92_v1 = vld [vmem:[#allocation2 + $0x50] sm:$0xff]  ;;  %v211_v2 = vld [vmem:[#allocation5 + $0x88] sm:$0xff]  ;;  %v333_v9 = vld [vmem:[#allocation5 + $0x458] sm:$0xff] }
  0x69   :  { %1684 = vmatprep.subr.bf16.mxu1 %v1683_v44  ;;  %v328_v6 = vld [vmem:[#allocation5 + $0x430] sm:$0xff]  ;;  %v331_v7 = vld [vmem:[#allocation5 + $0x448] sm:$0xff]  ;;  %v217_v14 = vld [vmem:[#allocation5 + $0xb8] sm:$0xff] }
  0x6a   :  { %1686 = vmatpush1.bf16.msra.mxu1 %v1685_v45  ;;  %v212_v12 = vld [vmem:[#allocation5 + $0x90] sm:$0xff]  ;;  %v215_v13 = vld [vmem:[#allocation5 + $0xa8] sm:$0xff]  ;;  %v1815_v18 = vpack.c.bf16 %v333_v9, %v331_v7  ;;  %v330_v19 = vld [vmem:[#allocation5 + $0x440] sm:$0xff] }
  0x6b   :  { %1774 = vmatpush1.bf16.msra.mxu0 %v1773_v50  ;;  %v1805_v50 = vpack.c.bf16 %v320_v36, %v318_v35  ;;  %1688 = vmatprep.subr.bf16.mxu1 %v1687_v52  ;;  %v91_v15 = vld [vmem:[#allocation2 + $0x48] sm:$0xff]  ;;  %v332_v20 = vld [vmem:[#allocation5 + $0x450] sm:$0xff]  ;;  %v337_v23 = vld [vmem:[#allocation5 + $0x478] sm:$0xff]  ;;  %v1699_v24 = vpack.c.bf16 %v217_v14, %v215_v13 }
  0x6c   :  { %1776 = vmatprep.subr.bf16.mxu0 %v1775_v51  ;;  %v322_v51 = vld [vmem:[#allocation5 + $0x400] sm:$0xff]  ;;  %v335_v21 = vld [vmem:[#allocation5 + $0x468] sm:$0xff]  ;;  %v216_v26 = vld [vmem:[#allocation5 + $0xb0] sm:$0xff]  ;;  %v1817_v30 = vpack.c.bf16 %v332_v20, %v330_v19 }
  0x6d   :  { %v1809_v0 = vpack.c.bf16 %v324_v54, %v322_v51  ;;  %v219_v27 = vld [vmem:[#allocation5 + $0xc8] sm:$0xff]  ;;  %v221_v28 = vld [vmem:[#allocation5 + $0xd8] sm:$0xff]  ;;  %v98_v29 = vld [vmem:[#allocation2 + $0x80] sm:$0xff]  ;;  %v1819_v32 = vpack.c.bf16 %v337_v23, %v335_v21 }
  0x6e   :  { %v106_v31 = vld [vmem:[#allocation2 + $0xc0] sm:$0xff]  ;;  %v339_v35 = vld [vmem:[#allocation5 + $0x488] sm:$0xff]  ;;  %v341_v37 = vld [vmem:[#allocation5 + $0x498] sm:$0xff] }
  0x6f   :  { %1778 = vmatpush1.bf16.msra.mxu0 %v1777_v56  ;;  %v329_v56 = vld [vmem:[#allocation5 + $0x438] sm:$0xff]  ;;  %v334_v33 = vld [vmem:[#allocation5 + $0x460] sm:$0xff]  ;;  %v220_v40 = vld [vmem:[#allocation5 + $0xd0] sm:$0xff]  ;;  %v1823_v46 = vpack.c.bf16 %v341_v37, %v339_v35 }
  0x70   :  { %1780 = vmatprep.subr.bf16.mxu0 %v1779_v57  ;;  %v1689_v57 = vpack.c.bf16 %v204_v49, %v202_v48  ;;  %v218_v39 = vld [vmem:[#allocation5 + $0xc0] sm:$0xff]  ;;  %v223_v41 = vld [vmem:[#allocation5 + $0xe8] sm:$0xff]  ;;  %v225_v42 = vld [vmem:[#allocation5 + $0xf8] sm:$0xff] }
  0x71   :  { %v105_v43 = vld [vmem:[#allocation2 + $0xb8] sm:$0xff]  ;;  %v338_v47 = vld [vmem:[#allocation5 + $0x480] sm:$0xff]  ;;  %v340_v48 = vld [vmem:[#allocation5 + $0x490] sm:$0xff]  ;;  %v1707_v52 = vpack.c.bf16 %v225_v42, %v223_v41 }
  0x72   :  { %1690 = vmatpush1.bf16.msra.mxu1 %v1689_v57  ;;  %v113_v45 = vld [vmem:[#allocation2 + $0xf8] sm:$0xff]  ;;  %v343_v49 = vld [vmem:[#allocation5 + $0x4a8] sm:$0xff]  ;;  %v224_v54 = vld [vmem:[#allocation5 + $0xf0] sm:$0xff] }
  0x73   :  { %1782 = vmatpush1.bf16.msra.mxu0 %v1781_v62  ;;  %v1691_v62 = vpack.c.bf16 %v209_v59, %v207_v58  ;;  %v345_v51 = vld [vmem:[#allocation5 + $0x4b8] sm:$0xff]  ;;  %v112_v57 = vld [vmem:[#allocation2 + $0xf0] sm:$0xff]  ;;  %v1825_v58 = vpack.c.bf16 %v340_v48, %v338_v47  ;;  %v119_v7 = vld [vmem:[#allocation2 + $0x128] sm:$0xff] }
  0x74   :  { %1784 = vmatprep.subr.bf16.mxu0 %v1783_v63  ;;  %v208_v63 = vld [vmem:[#allocation5 + $0x70] sm:$0xff]  ;;  %v127_v9 = vld [vmem:[#allocation2 + $0x168] sm:$0xff]  ;;  %v237_v20 = vld [vmem:[#allocation5 + $0x158] sm:$0xff] }
  0x75   :  { %v1693_v8 = vpack.c.bf16 %v208_v63, %v206_v60  ;;  %1692 = vmatprep.subr.bf16.mxu1 %v1691_v62  ;;  %v120_v59 = vld [vmem:[#allocation2 + $0x130] sm:$0xff]  ;;  %v1827_v60 = vpack.c.bf16 %v345_v51, %v343_v49  ;;  %v347_v63 = vld [vmem:[#allocation5 + $0x4c8] sm:$0xff]  ;;  %v126_v21 = vld [vmem:[#allocation2 + $0x160] sm:$0xff] }
  0x76   :  { %v344_v62 = vld [vmem:[#allocation5 + $0x4b0] sm:$0xff]  ;;  %v351_v13 = vld [vmem:[#allocation5 + $0x4e8] sm:$0xff]  ;;  %v134_v23 = vld [vmem:[#allocation2 + $0x1a0] sm:$0xff] }
  0x77   :  { %1786 = vmatpush1.bf16.msra.mxu0 %v1785_v4  ;;  %v1811_v4 = vpack.c.bf16 %v329_v56, %v327_v55  ;;  %1694 = vmatpush1.bf16.msra.mxu1 %v1693_v8  ;;  %v227_v55 = vld [vmem:[#allocation5 + $0x108] sm:$0xff]  ;;  %v229_v56 = vld [vmem:[#allocation5 + $0x118] sm:$0xff]  ;;  %v140_v49 = vld [vmem:[#allocation2 + $0x1d0] sm:$0xff] }
  0x78   :  { %1788 = vmatprep.subr.bf16.mxu0 %v1787_v5  ;;  %v326_v5 = vld [vmem:[#allocation5 + $0x420] sm:$0xff]  ;;  %v235_v19 = vld [vmem:[#allocation5 + $0x148] sm:$0xff]  ;;  %v133_v35 = vld [vmem:[#allocation2 + $0x198] sm:$0xff] }
  0x79   :  { %v141_v37 = vld [vmem:[#allocation2 + $0x1d8] sm:$0xff]  ;;  %v359_v41 = vld [vmem:[#allocation5 + $0x528] sm:$0xff]  ;;  %v148_v51 = vld [vmem:[#allocation2 + $0x210] sm:$0xff] }
  0x7a   :  { %v243_v47 = vld [vmem:[#allocation5 + $0x188] sm:$0xff]  ;;  %v245_v48 = vld [vmem:[#allocation5 + $0x198] sm:$0xff] }
  0x7b   :  { %1790 = vmatpush1.bf16.msra.mxu0 %v1789_v10  ;;  %v1695_v10 = vpack.c.bf16 %v213_v3, %v211_v2  ;;  %v1711_v2 = vpack.c.bf16 %v229_v56, %v227_v55  ;;  %v226_v3 = vld [vmem:[#allocation5 + $0x100] sm:$0xff]  ;;  %v360_v55 = vld [vmem:[#allocation5 + $0x530] sm:$0xff]  ;;  %v363_v56 = vld [vmem:[#allocation5 + $0x548] sm:$0xff] }
  0x7c   :  { %1792 = vmatprep.subr.bf16.mxu0 %v1791_v11  ;;  %v210_v11 = vld [vmem:[#allocation5 + $0x80] sm:$0xff] }
  0x7d   :  { %1696 = vmatprep.subr.bf16.mxu1 %v1695_v10 }
  0x7f   :  { %1794 = vmatpush1.bf16.msra.mxu0 %v1793_v16  ;;  %v1813_v16 = vpack.c.bf16 %v328_v6, %v326_v5  ;;  %v231_v5 = vld [vmem:[#allocation5 + $0x128] sm:$0xff]  ;;  %v233_v6 = vld [vmem:[#allocation5 + $0x138] sm:$0xff] }
  0x80   :  { %1796 = vmatprep.subr.bf16.mxu0 %v1795_v17  ;;  %v99_v17 = vld [vmem:[#allocation2 + $0x88] sm:$0xff] }
  0x83   :  { %1798 = vmatpush1.bf16.msra.mxu0 %v1797_v22  ;;  %v1697_v22 = vpack.c.bf16 %v212_v12, %v210_v11  ;;  %v346_v11 = vld [vmem:[#allocation5 + $0x4c0] sm:$0xff]  ;;  %v348_v12 = vld [vmem:[#allocation5 + $0x4d0] sm:$0xff] }
  0x84   :  { %1800 = vmatprep.subr.bf16.mxu0 %v1799_v25  ;;  %v214_v25 = vld [vmem:[#allocation5 + $0xa0] sm:$0xff] }
  0x85   :  { %1698 = vmatpush1.bf16.msra.mxu1 %v1697_v22  ;;  %v1701_v36 = vpack.c.bf16 %v216_v26, %v214_v25  ;;  %v1833_v22 = vpack.c.bf16 %v348_v12, %v346_v11  ;;  %v350_v25 = vld [vmem:[#allocation5 + $0x4e0] sm:$0xff]  ;;  %v352_v26 = vld [vmem:[#allocation5 + $0x4f0] sm:$0xff]  ;;  %v251_v12 = vld [vmem:[#allocation5 + $0x1c8] sm:$0xff] }
  0x86   :  { %1700 = vmatprep.subr.bf16.mxu1 %v1699_v24  ;;  %v248_v11 = vld [vmem:[#allocation5 + $0x1b0] sm:$0xff] }
  0x87   :  { %1802 = vmatpush1.bf16.msra.mxu0 %v1801_v34  ;;  %v336_v34 = vld [vmem:[#allocation5 + $0x470] sm:$0xff] }
  0x88   :  { %1804 = vmatprep.subr.bf16.mxu0 %v1803_v38  ;;  %v1703_v38 = vpack.c.bf16 %v221_v28, %v219_v27  ;;  %v1821_v44 = vpack.c.bf16 %v336_v34, %v334_v33  ;;  %v355_v27 = vld [vmem:[#allocation5 + $0x508] sm:$0xff]  ;;  %v241_v34 = vld [vmem:[#allocation5 + $0x178] sm:$0xff] }
  0x89   :  { %1702 = vmatpush1.bf16.msra.mxu1 %v1701_v36  ;;  %v239_v33 = vld [vmem:[#allocation5 + $0x168] sm:$0xff]  ;;  %v1837_v36 = vpack.c.bf16 %v352_v26, %v350_v25  ;;  %v252_v25 = vld [vmem:[#allocation5 + $0x1d0] sm:$0xff] }
  0x8a   :  { %1704 = vmatprep.subr.bf16.mxu1 %v1703_v38  ;;  %v255_v26 = vld [vmem:[#allocation5 + $0x1e8] sm:$0xff] }
  0x8b   :  { %1806 = vmatpush1.bf16.msra.mxu0 %v1805_v50  ;;  %v1705_v50 = vpack.c.bf16 %v220_v40, %v218_v39  ;;  %v354_v39 = vld [vmem:[#allocation5 + $0x500] sm:$0xff]  ;;  %v356_v40 = vld [vmem:[#allocation5 + $0x510] sm:$0xff] }
  0x8c   :  { %1808 = vmatprep.subr.bf16.mxu0 %v1807_v53  ;;  %v222_v53 = vld [vmem:[#allocation5 + $0xe0] sm:$0xff] }
  0x8d   :  { %1706 = vmatpush1.bf16.msra.mxu1 %v1705_v50  ;;  %v1841_v50 = vpack.c.bf16 %v356_v40, %v354_v39  ;;  %v256_v39 = vld [vmem:[#allocation5 + $0x1f0] sm:$0xff] }
  0x8e   :  { %656 = vmatmul.mubr.f32.vlgmr.msra.gmra.mrb[0].mxu0 %v84_v61  ;;  %v342_v61 = vld [vmem:[#allocation5 + $0x4a0] sm:$0xff]  ;;  %1708 = vmatprep.subr.bf16.mxu1 %v1707_v52  ;;  %v83_v52 = vld [vmem:[#allocation2 + $0x8] sm:$0xff]  ;;  %v168_v40 = vld [vmem:[#allocation2 + $0x2b0] sm:$0xff] }
  0x8f   :  { %1810 = vmatpush1.bf16.msra.mxu0 %v1809_v0  ;;  %661 = vmatprep.mubr.f32.mxu0 %v92_v1  ;;  %v1709_v0 = vpack.c.bf16 %v224_v54, %v222_v53  ;;  %v349_v1 = vld [vmem:[#allocation5 + $0x4d8] sm:$0xff]  ;;  %v1829_v8 = vpack.c.bf16 %v344_v62, %v342_v61  ;;  %v358_v54 = vld [vmem:[#allocation5 + $0x520] sm:$0xff]  ;;  %v244_v61 = vld [vmem:[#allocation5 + $0x190] sm:$0xff] }
  0x90   :  { %1812 = vmatprep.subr.bf16.mxu0 %v1811_v4  ;;  %v228_v4 = vld [vmem:[#allocation5 + $0x110] sm:$0xff]  ;;  %v1831_v10 = vpack.c.bf16 %v349_v1, %v347_v63  ;;  %494 = vmatprep.mubr.f32.mxu1 %v83_v52  ;;  %v247_v62 = vld [vmem:[#allocation5 + $0x1a8] sm:$0xff]  ;;  %v249_v63 = vld [vmem:[#allocation5 + $0x1b8] sm:$0xff]  ;;  %v1845_v1 = vpack.c.bf16 %v360_v55, %v358_v54 }
  0x91   :  { %1710 = vmatpush1.bf16.msra.mxu1 %v1709_v0  ;;  %v1713_v14 = vpack.c.bf16 %v228_v4, %v226_v3  ;;  %v147_v0 = vld [vmem:[#allocation2 + $0x208] sm:$0xff]  ;;  %v362_v4 = vld [vmem:[#allocation5 + $0x540] sm:$0xff]  ;;  %v380_v54 = vld [vmem:[#allocation5 + $0x5d0] sm:$0xff] }
  0x92   :  { %662 = vmatmul.mubr.f32.gmra.mrb[2].mxu0 %v91_v15  ;;  %v353_v15 = vld [vmem:[#allocation5 + $0x4f8] sm:$0xff]  ;;  %1712 = vmatprep.subr.bf16.mxu1 %v1711_v2  ;;  %v155_v2 = vld [vmem:[#allocation2 + $0x248] sm:$0xff] }
  0x93   :  { %1814 = vmatpush1.bf16.msra.mxu0 %v1813_v16  ;;  %667 = vmatprep.mubr.f32.mxu0 %v99_v17  ;;  %v1715_v16 = vpack.c.bf16 %v233_v6, %v231_v5  ;;  %v230_v17 = vld [vmem:[#allocation5 + $0x120] sm:$0xff]  ;;  %v1835_v24 = vpack.c.bf16 %v353_v15, %v351_v13  ;;  %v364_v5 = vld [vmem:[#allocation5 + $0x550] sm:$0xff]  ;;  %v367_v6 = vld [vmem:[#allocation5 + $0x568] sm:$0xff] }
  0x94   :  { %1816 = vmatprep.subr.bf16.mxu0 %v1815_v18  ;;  %v232_v18 = vld [vmem:[#allocation5 + $0x130] sm:$0xff]  ;;  %v253_v13 = vld [vmem:[#allocation5 + $0x1d8] sm:$0xff]  ;;  %v1849_v15 = vpack.c.bf16 %v364_v5, %v362_v4  ;;  %v383_v55 = vld [vmem:[#allocation5 + $0x5e8] sm:$0xff] }
  0x95   :  { %1714 = vmatpush1.bf16.msra.mxu1 %v1713_v14  ;;  %v1717_v28 = vpack.c.bf16 %v232_v18, %v230_v17  ;;  %v154_v14 = vld [vmem:[#allocation2 + $0x240] sm:$0xff]  ;;  %v97_v4 = vld [vmem:[#allocation2 + $0x78] sm:$0xff] }
  0x96   :  { %668 = vmatmul.mubr.f32.gmra.mrb[4].mxu0 %v98_v29  ;;  %v357_v29 = vld [vmem:[#allocation5 + $0x518] sm:$0xff]  ;;  %1716 = vmatprep.subr.bf16.mxu1 %v1715_v16  ;;  %v162_v16 = vld [vmem:[#allocation2 + $0x280] sm:$0xff] }
  0x97   :  { %1818 = vmatpush1.bf16.msra.mxu0 %v1817_v30  ;;  %673 = vmatprep.mubr.f32.mxu0 %v106_v31  ;;  %v1719_v30 = vpack.c.bf16 %v237_v20, %v235_v19  ;;  %v234_v31 = vld [vmem:[#allocation5 + $0x140] sm:$0xff]  ;;  %v1839_v38 = vpack.c.bf16 %v357_v29, %v355_v27  ;;  %v368_v19 = vld [vmem:[#allocation5 + $0x570] sm:$0xff]  ;;  %v371_v20 = vld [vmem:[#allocation5 + $0x588] sm:$0xff] }
  0x98   :  { %1820 = vmatprep.subr.bf16.mxu0 %v1819_v32  ;;  %v236_v32 = vld [vmem:[#allocation5 + $0x150] sm:$0xff]  ;;  %v366_v18 = vld [vmem:[#allocation5 + $0x560] sm:$0xff]  ;;  %v257_v27 = vld [vmem:[#allocation5 + $0x1f8] sm:$0xff] }
  0x99   :  { %1718 = vmatpush1.bf16.msra.mxu1 %v1717_v28  ;;  %v1721_v42 = vpack.c.bf16 %v236_v32, %v234_v31  ;;  %v161_v28 = vld [vmem:[#allocation2 + $0x278] sm:$0xff]  ;;  %v1853_v29 = vpack.c.bf16 %v368_v19, %v366_v18  ;;  %v370_v32 = vld [vmem:[#allocation5 + $0x580] sm:$0xff]  ;;  %v1123_v19 = vld [vmem:[#allocation7 + $0x88] sm:$0xff] }
  0x9a   :  { %674 = vmatmul.mubr.f32.gmra.mrb[6].mxu0 %v105_v43  ;;  %v361_v43 = vld [vmem:[#allocation5 + $0x538] sm:$0xff]  ;;  %1720 = vmatprep.subr.bf16.mxu1 %v1719_v30  ;;  %v1122_v18 = vld [vmem:[#allocation7 + $0x80] sm:$0xff] }
  0x9b   :  { %1822 = vmatpush1.bf16.msra.mxu0 %v1821_v44  ;;  %679 = vmatprep.mubr.f32.mxu0 %v113_v45  ;;  %v1723_v44 = vpack.c.bf16 %v241_v34, %v239_v33  ;;  %v238_v45 = vld [vmem:[#allocation5 + $0x160] sm:$0xff]  ;;  %v1843_v53 = vpack.c.bf16 %v361_v43, %v359_v41  ;;  %v169_v30 = vld [vmem:[#allocation2 + $0x2b8] sm:$0xff]  ;;  %v372_v33 = vld [vmem:[#allocation5 + $0x590] sm:$0xff] }
  0x9c   :  { %1824 = vmatprep.subr.bf16.mxu0 %v1823_v46  ;;  %v240_v46 = vld [vmem:[#allocation5 + $0x170] sm:$0xff]  ;;  %v375_v34 = vld [vmem:[#allocation5 + $0x5a8] sm:$0xff]  ;;  %v1857_v41 = vpack.c.bf16 %v372_v33, %v370_v32  ;;  %v189_v5 = vld [vmem:[#allocation2 + $0x358] sm:$0xff] }
  0x9d   :  { %1722 = vmatpush1.bf16.msra.mxu1 %v1721_v42  ;;  %v176_v42 = vld [vmem:[#allocation2 + $0x2f0] sm:$0xff]  ;;  %v397_v32 = vld [vmem:[#allocation5 + $0x658] sm:$0xff]  ;;  %v103_v33 = vld [vmem:[#allocation2 + $0xa8] sm:$0xff] }
  0x9e   :  { %680 = vmatmul.mubr.f32.gmra.mrb[8].mxu0 %v112_v57  ;;  %v1725_v57 = vpack.c.bf16 %v240_v46, %v238_v45  ;;  %1724 = vmatprep.subr.bf16.mxu1 %v1723_v44  ;;  %v374_v44 = vld [vmem:[#allocation5 + $0x5a0] sm:$0xff]  ;;  %v376_v45 = vld [vmem:[#allocation5 + $0x5b0] sm:$0xff] }
  0x9f   :  { %1826 = vmatpush1.bf16.msra.mxu0 %v1825_v58  ;;  %685 = vmatprep.mubr.f32.mxu0 %v120_v59  ;;  %v365_v58 = vld [vmem:[#allocation5 + $0x558] sm:$0xff]  ;;  %v1727_v59 = vpack.c.bf16 %v245_v48, %v243_v47  ;;  %v379_v47 = vld [vmem:[#allocation5 + $0x5c8] sm:$0xff] }
  0xa0   :  { %1828 = vmatprep.subr.bf16.mxu0 %v1827_v60  ;;  %v242_v60 = vld [vmem:[#allocation5 + $0x180] sm:$0xff]  ;;  %v1847_v3 = vpack.c.bf16 %v365_v58, %v363_v56  ;;  %v381_v48 = vld [vmem:[#allocation5 + $0x5d8] sm:$0xff] }
  0xa1   :  { %1726 = vmatpush1.bf16.msra.mxu1 %v1725_v57  ;;  %v1863_v52 = vpack.c.bf16 %v381_v48, %v379_v47  ;;  %v385_v56 = vld [vmem:[#allocation5 + $0x5f8] sm:$0xff]  ;;  %v82_v57 = vld [vmem:[#allocation2] sm:$0xff]  ;;  %v399_v47 = vld [vmem:[#allocation5 + $0x668] sm:$0xff] }
  0xa2   :  { %686 = vmatmul.mubr.f32.gmra.mrb[10].mxu0 %v119_v7  ;;  %v1729_v7 = vpack.c.bf16 %v244_v61, %v242_v60  ;;  %1728 = vmatprep.subr.bf16.mxu1 %v1727_v59  ;;  %v90_v58 = vld [vmem:[#allocation2 + $0x40] sm:$0xff]  ;;  %v401_v48 = vld [vmem:[#allocation5 + $0x678] sm:$0xff] }
  0xa3   :  { %1830 = vmatpush1.bf16.msra.mxu0 %v1829_v8  ;;  %691 = vmatprep.mubr.f32.mxu0 %v127_v9  ;;  %v369_v8 = vld [vmem:[#allocation5 + $0x578] sm:$0xff]  ;;  %v1731_v9 = vpack.c.bf16 %v249_v63, %v247_v62  ;;  %v182_v59 = vld [vmem:[#allocation2 + $0x320] sm:$0xff]  ;;  %v1867_v62 = vpack.c.bf16 %v385_v56, %v383_v55  ;;  %v100_v55 = vld [vmem:[#allocation2 + $0x90] sm:$0xff] }
  0xa4   :  { %1832 = vmatprep.subr.bf16.mxu0 %v1831_v10  ;;  %v246_v10 = vld [vmem:[#allocation5 + $0x1a0] sm:$0xff]  ;;  %v1851_v17 = vpack.c.bf16 %v369_v8, %v367_v6 }
  0xa5   :  { %1730 = vmatpush1.bf16.msra.mxu1 %v1729_v7  ;;  %v190_v61 = vld [vmem:[#allocation2 + $0x360] sm:$0xff]  ;;  %v87_v7 = vld [vmem:[#allocation2 + $0x28] sm:$0xff] }
  0xa6   :  { %692 = vmatmul.mubr.f32.gmra.mrb[12].mxu0 %v126_v21  ;;  %v1733_v21 = vpack.c.bf16 %v248_v11, %v246_v10  ;;  %1732 = vmatprep.subr.bf16.mxu1 %v1731_v9  ;;  %v382_v63 = vld [vmem:[#allocation5 + $0x5e0] sm:$0xff]  ;;  %v388_v10 = vld [vmem:[#allocation5 + $0x610] sm:$0xff]  ;;  %v391_v11 = vld [vmem:[#allocation5 + $0x628] sm:$0xff] }
  0xa7   :  { %1834 = vmatpush1.bf16.msra.mxu0 %v1833_v22  ;;  %697 = vmatprep.mubr.f32.mxu0 %v134_v23  ;;  %v373_v22 = vld [vmem:[#allocation5 + $0x598] sm:$0xff]  ;;  %v1735_v23 = vpack.c.bf16 %v253_v13, %v251_v12  ;;  %v386_v9 = vld [vmem:[#allocation5 + $0x600] sm:$0xff] }
  0xa8   :  { %1836 = vmatprep.subr.bf16.mxu0 %v1835_v24  ;;  %v250_v24 = vld [vmem:[#allocation5 + $0x1c0] sm:$0xff]  ;;  %v1855_v31 = vpack.c.bf16 %v373_v22, %v371_v20  ;;  %v393_v13 = vld [vmem:[#allocation5 + $0x638] sm:$0xff]  ;;  %v1903_v22 = vpack.c.bf16 %v1123_v19, %v1122_v18  ;;  %v132_v19 = vld [vmem:[#allocation2 + $0x190] sm:$0xff] }
  0xa9   :  { %1734 = vmatpush1.bf16.msra.mxu1 %v1733_v21  ;;  %v86_v12 = vld [vmem:[#allocation2 + $0x20] sm:$0xff]  ;;  %v1873_v21 = vpack.c.bf16 %v388_v10, %v386_v9  ;;  %v1115_v10 = vld [vmem:[#allocation7 + $0x48] sm:$0xff] }
  0xaa   :  { %698 = vmatmul.mubr.f32.gmra.mrb[14].mxu0 %v133_v35  ;;  %v1737_v35 = vpack.c.bf16 %v252_v25, %v250_v24  ;;  %1736 = vmatprep.subr.bf16.mxu1 %v1735_v23  ;;  %v1106_v20 = vld [vmem:[#allocation7] sm:$0xff]  ;;  %v1107_v23 = vld [vmem:[#allocation7 + $0x8] sm:$0xff]  ;;  %v1124_v24 = vld [vmem:[#allocation7 + $0x90] sm:$0xff] }
  0xab   :  { %1838 = vmatpush1.bf16.msra.mxu0 %v1837_v36  ;;  %703 = vmatprep.mubr.f32.mxu0 %v141_v37  ;;  %v377_v36 = vld [vmem:[#allocation5 + $0x5b8] sm:$0xff]  ;;  %v1739_v37 = vpack.c.bf16 %v257_v27, %v255_v26  ;;  %v1875_v26 = vpack.c.bf16 %v393_v13, %v391_v11  ;;  %v392_v27 = vld [vmem:[#allocation5 + $0x630] sm:$0xff]  ;;  %v1114_v9 = vld [vmem:[#allocation7 + $0x40] sm:$0xff] }
  0xac   :  { %1840 = vmatprep.subr.bf16.mxu0 %v1839_v38  ;;  %v254_v38 = vld [vmem:[#allocation5 + $0x1e0] sm:$0xff]  ;;  %v1859_v43 = vpack.c.bf16 %v377_v36, %v375_v34  ;;  %v1125_v25 = vld [vmem:[#allocation7 + $0x98] sm:$0xff]  ;;  %v115_v11 = vld [vmem:[#allocation2 + $0x108] sm:$0xff] }
  0xad   :  { %1738 = vmatpush1.bf16.msra.mxu1 %v1737_v35  ;;  %v1741_v46 = vpack.c.bf16 %v256_v39, %v254_v38  ;;  %v1907_v34 = vpack.c.bf16 %v1125_v25, %v1124_v24  ;;  %v111_v35 = vld [vmem:[#allocation2 + $0xe8] sm:$0xff]  ;;  %v93_v39 = vld [vmem:[#allocation2 + $0x58] sm:$0xff]  ;;  %v402_v13 = vld [vmem:[#allocation5 + $0x680] sm:$0xff] }
  0xae   :  { %704 = vmatmul.mubr.f32.gmra.mrb[16].mxu0 %v140_v49  ;;  %1740 = vmatprep.subr.bf16.mxu1 %v1739_v37  ;;  %v175_v49 = vld [vmem:[#allocation2 + $0x2e8] sm:$0xff]  ;;  %v1126_v37 = vld [vmem:[#allocation7 + $0xa0] sm:$0xff]  ;;  %v1116_v25 = vld [vmem:[#allocation7 + $0x50] sm:$0xff] }
  0xaf   :  { %1842 = vmatpush1.bf16.msra.mxu0 %v1841_v50  ;;  %709 = vmatprep.mubr.f32.mxu0 %v148_v51  ;;  %v1861_v50 = vpack.c.bf16 %v376_v45, %v374_v44  ;;  %v183_v51 = vld [vmem:[#allocation2 + $0x328] sm:$0xff]  ;;  %v394_v45 = vld [vmem:[#allocation5 + $0x640] sm:$0xff] }
  0xb0   :  { %1844 = vmatprep.subr.bf16.mxu0 %v1843_v53  ;;  %v378_v53 = vld [vmem:[#allocation5 + $0x5c0] sm:$0xff]  ;;  %v1127_v38 = vld [vmem:[#allocation7 + $0xa8] sm:$0xff] }
  0xb1   :  { %1742 = vmatpush1.bf16.msra.mxu1 %v1741_v46  ;;  %v1865_v60 = vpack.c.bf16 %v380_v54, %v378_v53  ;;  %v396_v46 = vld [vmem:[#allocation5 + $0x650] sm:$0xff]  ;;  %v1129_v54 = vld [vmem:[#allocation7 + $0xb8] sm:$0xff] }
  0xb2   :  { %710 = vmatmul.mubr.f32.gmra.mrb[18].mxu0 %v147_v0  ;;  %v384_v0 = vld [vmem:[#allocation5 + $0x5f0] sm:$0xff]  ;;  %1904 = vmatprep.subr.bf16.mxu1 %v1903_v22  ;;  %v1881_v56 = vpack.c.bf16 %v396_v46, %v394_v45  ;;  %v1133_v22 = vld [vmem:[#allocation7 + $0xd8] sm:$0xff]  ;;  %v410_v45 = vld [vmem:[#allocation5 + $0x6c0] sm:$0xff] }
  0xb3   :  { %1846 = vmatpush1.bf16.msra.mxu0 %v1845_v1  ;;  %715 = vmatprep.mubr.f32.mxu0 %v155_v2  ;;  %v387_v1 = vld [vmem:[#allocation5 + $0x608] sm:$0xff]  ;;  %v389_v2 = vld [vmem:[#allocation5 + $0x618] sm:$0xff]  ;;  %v1869_v6 = vpack.c.bf16 %v384_v0, %v382_v63  ;;  %v1128_v53 = vld [vmem:[#allocation7 + $0xb0] sm:$0xff] }
  0xb4   :  { %1848 = vmatprep.subr.bf16.mxu0 %v1847_v3  ;;  %495 = vmatmul.mubr.f32.vlgmr.msra.gmra.mrb[0].mxu1 %v82_v57  ;;  %v89_v3 = vld [vmem:[#allocation2 + $0x38] sm:$0xff]  ;;  %v1871_v8 = vpack.c.bf16 %v389_v2, %v387_v1  ;;  %v1112_v57 = vld [vmem:[#allocation7 + $0x30] sm:$0xff]  ;;  %v403_v63 = vld [vmem:[#allocation5 + $0x688] sm:$0xff]  ;;  %v1915_v2 = vpack.c.bf16 %v1129_v54, %v1128_v53 }
  0xb5   :  { %500 = vmatprep.mubr.f32.mxu1 %v90_v58  ;;  %v1113_v58 = vld [vmem:[#allocation7 + $0x38] sm:$0xff]  ;;  %v412_v46 = vld [vmem:[#allocation5 + $0x6d0] sm:$0xff] }
  0xb6   :  { %716 = vmatmul.mubr.f32.gmra.mrb[20].mxu0 %v154_v14  ;;  %v96_v14 = vld [vmem:[#allocation2 + $0x70] sm:$0xff]  ;;  %v405_v0 = vld [vmem:[#allocation5 + $0x698] sm:$0xff]  ;;  %v1897_v54 = vpack.c.bf16 %v412_v46, %v410_v45 }
  0xb7   :  { %1850 = vmatpush1.bf16.msra.mxu0 %v1849_v15  ;;  %721 = vmatprep.mubr.f32.mxu0 %v162_v16  ;;  %v104_v15 = vld [vmem:[#allocation2 + $0xb0] sm:$0xff]  ;;  %v94_v16 = vld [vmem:[#allocation2 + $0x60] sm:$0xff]  ;;  %v117_v1 = vld [vmem:[#allocation2 + $0x118] sm:$0xff] }
  0xb8   :  { %1852 = vmatprep.subr.bf16.mxu0 %v1851_v17  ;;  %501 = vmatmul.mubr.f32.gmra.mrb[2].mxu1 %v89_v3  ;;  %v390_v17 = vld [vmem:[#allocation5 + $0x620] sm:$0xff]  ;;  %v125_v3 = vld [vmem:[#allocation2 + $0x158] sm:$0xff]  ;;  %v128_v53 = vld [vmem:[#allocation2 + $0x170] sm:$0xff] }
  0xb9   :  { %506 = vmatprep.mubr.f32.mxu1 %v97_v4  ;;  %v1917_v4 = vpack.c.bf16 %v1113_v58, %v1112_v57  ;;  %v414_v57 = vld [vmem:[#allocation5 + $0x6e0] sm:$0xff]  ;;  %v416_v58 = vld [vmem:[#allocation5 + $0x6f0] sm:$0xff]  ;;  %v193_v45 = vld [vmem:[#allocation2 + $0x378] sm:$0xff] }
  0xba   :  { %722 = vmatmul.mubr.f32.gmra.mrb[22].mxu0 %v161_v28  ;;  %v1905_v28 = vpack.c.bf16 %v1107_v23, %v1106_v20  ;;  %v1921_v20 = vpack.c.bf16 %v1115_v10, %v1114_v9  ;;  %v114_v23 = vld [vmem:[#allocation2 + $0x100] sm:$0xff]  ;;  %v156_v10 = vld [vmem:[#allocation2 + $0x250] sm:$0xff] }
  0xbb   :  { %1854 = vmatpush1.bf16.msra.mxu0 %v1853_v29  ;;  %727 = vmatprep.mubr.f32.mxu0 %v169_v30  ;;  %v1108_v29 = vld [vmem:[#allocation7 + $0x10] sm:$0xff]  ;;  %v1109_v30 = vld [vmem:[#allocation7 + $0x18] sm:$0xff]  ;;  %v174_v9 = vld [vmem:[#allocation2 + $0x2e0] sm:$0xff] }
  0xbc   :  { %1856 = vmatprep.subr.bf16.mxu0 %v1855_v31  ;;  %507 = vmatmul.mubr.f32.gmra.mrb[4].mxu1 %v96_v14  ;;  %v395_v31 = vld [vmem:[#allocation5 + $0x648] sm:$0xff]  ;;  %v1909_v36 = vpack.c.bf16 %v1109_v30, %v1108_v29  ;;  %v404_v14 = vld [vmem:[#allocation5 + $0x690] sm:$0xff]  ;;  %v406_v29 = vld [vmem:[#allocation5 + $0x6a0] sm:$0xff] }
  0xbd   :  { %512 = vmatprep.mubr.f32.mxu1 %v104_v15  ;;  %1906 = vmatpush3.bf16.msra.mxu1 %v1905_v28  ;;  %v1879_v44 = vpack.c.bf16 %v397_v32, %v395_v31  ;;  %v407_v15 = vld [vmem:[#allocation5 + $0x6a8] sm:$0xff]  ;;  %v1889_v24 = vpack.c.bf16 %v404_v14, %v402_v13  ;;  %v408_v30 = vld [vmem:[#allocation5 + $0x6b0] sm:$0xff]  ;;  %v413_v32 = vld [vmem:[#allocation5 + $0x6d8] sm:$0xff] }
  0xbe   :  { %728 = vmatmul.mubr.f32.gmra.mrb[24].mxu0 %v168_v40  ;;  %v1877_v40 = vpack.c.bf16 %v392_v27, %v390_v17  ;;  %1908 = vmatprep.subr.bf16.mxu1 %v1907_v34  ;;  %v124_v17 = vld [vmem:[#allocation2 + $0x150] sm:$0xff]  ;;  %v122_v27 = vld [vmem:[#allocation2 + $0x140] sm:$0xff]  ;;  %v411_v31 = vld [vmem:[#allocation5 + $0x6c8] sm:$0xff] }
  0xbf   :  { %1858 = vmatpush1.bf16.msra.mxu0 %v1857_v41  ;;  %733 = vmatprep.mubr.f32.mxu0 %v176_v42  ;;  %v1110_v41 = vld [vmem:[#allocation7 + $0x20] sm:$0xff]  ;;  %v1111_v42 = vld [vmem:[#allocation7 + $0x28] sm:$0xff]  ;;  %v181_v13 = vld [vmem:[#allocation2 + $0x318] sm:$0xff] }
  0xc0   :  { %1860 = vmatprep.subr.bf16.mxu0 %v1859_v43  ;;  %v101_v43 = vld [vmem:[#allocation2 + $0x98] sm:$0xff]  ;;  %513 = vmatmul.mubr.f32.gmra.mrb[6].mxu1 %v103_v33  ;;  %v131_v33 = vld [vmem:[#allocation2 + $0x188] sm:$0xff]  ;;  %v1120_v46 = vld [vmem:[#allocation7 + $0x70] sm:$0xff] }
  0xc1   :  { %518 = vmatprep.mubr.f32.mxu1 %v111_v35  ;;  %1910 = vmatpush3.bf16.msra.mxu1 %v1909_v36  ;;  %v139_v35 = vld [vmem:[#allocation2 + $0x1c8] sm:$0xff] }
  0xc2   :  { %734 = vmatmul.mubr.f32.gmra.mrb[26].mxu0 %v175_v49  ;;  %v110_v49 = vld [vmem:[#allocation2 + $0xe0] sm:$0xff]  ;;  %v163_v14 = vld [vmem:[#allocation2 + $0x288] sm:$0xff] }
  0xc3   :  { %1862 = vmatpush1.bf16.msra.mxu0 %v1861_v50  ;;  %739 = vmatprep.mubr.f32.mxu0 %v183_v51  ;;  %v1911_v50 = vpack.c.bf16 %v1127_v38, %v1126_v37  ;;  %v118_v51 = vld [vmem:[#allocation2 + $0x120] sm:$0xff]  ;;  %v1135_v38 = vld [vmem:[#allocation7 + $0xe8] sm:$0xff] }
  0xc4   :  { %1864 = vmatprep.subr.bf16.mxu0 %v1863_v52  ;;  %v1913_v52 = vpack.c.bf16 %v1111_v42, %v1110_v41  ;;  %519 = vmatmul.mubr.f32.gmra.mrb[8].mxu1 %v110_v49  ;;  %v1134_v37 = vld [vmem:[#allocation7 + $0xe0] sm:$0xff]  ;;  %v1119_v42 = vld [vmem:[#allocation7 + $0x68] sm:$0xff] }
  0xc5   :  { %524 = vmatprep.mubr.f32.mxu1 %v118_v51  ;;  %1912 = vmatprep.subr.bf16.mxu1 %v1911_v50  ;;  %v1118_v41 = vld [vmem:[#allocation7 + $0x60] sm:$0xff]  ;;  %v1927_v50 = vpack.c.bf16 %v1135_v38, %v1134_v37  ;;  %v137_v37 = vld [vmem:[#allocation2 + $0x1b8] sm:$0xff]  ;;  %v144_v38 = vld [vmem:[#allocation2 + $0x1f0] sm:$0xff] }
  0xc6   :  { %740 = vmatmul.mubr.f32.gmra.mrb[28].mxu0 %v182_v59  ;;  %v108_v59 = vld [vmem:[#allocation2 + $0xd0] sm:$0xff]  ;;  %1914 = vmatpush3.bf16.msra.mxu1 %v1913_v52  ;;  %v138_v49 = vld [vmem:[#allocation2 + $0x1c0] sm:$0xff]  ;;  %v1929_v52 = vpack.c.bf16 %v1119_v42, %v1118_v41  ;;  %v165_v41 = vld [vmem:[#allocation2 + $0x298] sm:$0xff] }
  0xc7   :  { %1866 = vmatpush1.bf16.msra.mxu0 %v1865_v60  ;;  %745 = vmatprep.mubr.f32.mxu0 %v190_v61  ;;  %v1883_v60 = vpack.c.bf16 %v401_v48, %v399_v47  ;;  %v398_v61 = vld [vmem:[#allocation5 + $0x660] sm:$0xff]  ;;  %v415_v47 = vld [vmem:[#allocation5 + $0x6e8] sm:$0xff]  ;;  %v417_v48 = vld [vmem:[#allocation5 + $0x6f8] sm:$0xff] }
  0xc8   :  { %1868 = vmatprep.subr.bf16.mxu0 %v1867_v62  ;;  %v400_v62 = vld [vmem:[#allocation5 + $0x670] sm:$0xff]  ;;  %525 = vmatmul.mubr.f32.gmra.mrb[10].mxu1 %v117_v1  ;;  %v146_v51 = vld [vmem:[#allocation2 + $0x200] sm:$0xff] }
  0xc9   :  { %530 = vmatprep.mubr.f32.mxu1 %v125_v3  ;;  %1916 = vmatprep.subr.bf16.mxu1 %v1915_v2  ;;  %v160_v1 = vld [vmem:[#allocation2 + $0x270] sm:$0xff]  ;;  %v142_v2 = vld [vmem:[#allocation2 + $0x1e0] sm:$0xff] }
  0xca   :  { %746 = vmatmul.mubr.f32.gmra.mrb[30].mxu0 %v189_v5  ;;  %v1130_v5 = vld [vmem:[#allocation7 + $0xc0] sm:$0xff]  ;;  %1918 = vmatpush3.bf16.msra.mxu1 %v1917_v4  ;;  %v159_v4 = vld [vmem:[#allocation2 + $0x268] sm:$0xff]  ;;  %v172_v42 = vld [vmem:[#allocation2 + $0x2d0] sm:$0xff] }
  0xcb   :  { %1870 = vmatpush1.bf16.msra.mxu0 %v1869_v6  ;;  %816 = vmatprep.mubr.f32.mxu0 %v87_v7  ;;  %v1131_v6 = vld [vmem:[#allocation7 + $0xc8] sm:$0xff]  ;;  %v150_v3 = vld [vmem:[#allocation2 + $0x220] sm:$0xff] }
  0xcc   :  { %1872 = vmatprep.subr.bf16.mxu0 %v1871_v8  ;;  %v107_v7 = vld [vmem:[#allocation2 + $0xc8] sm:$0xff]  ;;  %v1885_v8 = vpack.c.bf16 %v400_v62, %v398_v61  ;;  %v1919_v18 = vpack.c.bf16 %v1131_v6, %v1130_v5  ;;  %531 = vmatmul.mubr.f32.gmra.mrb[12].mxu1 %v124_v17  ;;  %v1901_v62 = vpack.c.bf16 %v416_v58, %v414_v57  ;;  %v149_v6 = vld [vmem:[#allocation2 + $0x218] sm:$0xff]  ;;  %v188_v17 = vld [vmem:[#allocation2 + $0x350] sm:$0xff] }
  0xcd   :  { %536 = vmatprep.mubr.f32.mxu1 %v132_v19  ;;  %v135_v61 = vld [vmem:[#allocation2 + $0x1a8] sm:$0xff]  ;;  %v178_v19 = vld [vmem:[#allocation2 + $0x300] sm:$0xff] }
  0xce   :  { %817 = vmatmul.mubr.f32.vlgmr.msra.gmra.mrb[0].mxu0 %v86_v12  ;;  %v1887_v12 = vpack.c.bf16 %v405_v0, %v403_v63  ;;  %1920 = vmatprep.subr.bf16.mxu1 %v1919_v18  ;;  %v143_v63 = vld [vmem:[#allocation2 + $0x1e8] sm:$0xff]  ;;  %v152_v0 = vld [vmem:[#allocation2 + $0x230] sm:$0xff]  ;;  %v170_v18 = vld [vmem:[#allocation2 + $0x2c0] sm:$0xff] }
  0xcf   :  { %1874 = vmatpush1.bf16.msra.mxu0 %v1873_v21  ;;  %822 = vmatprep.mubr.f32.mxu0 %v94_v16  ;;  %v409_v16 = vld [vmem:[#allocation5 + $0x6b8] sm:$0xff]  ;;  %v1132_v21 = vld [vmem:[#allocation7 + $0xd0] sm:$0xff]  ;;  %v167_v5 = vld [vmem:[#allocation2 + $0x2a8] sm:$0xff] }
  0xd0   :  { %1876 = vmatprep.subr.bf16.mxu0 %v1875_v26  ;;  %v1117_v26 = vld [vmem:[#allocation7 + $0x58] sm:$0xff]  ;;  %v1891_v28 = vpack.c.bf16 %v409_v16, %v407_v15  ;;  %v1923_v34 = vpack.c.bf16 %v1133_v22, %v1132_v21  ;;  %1922 = vmatpush3.bf16.msra.mxu1 %v1921_v20  ;;  %v171_v15 = vld [vmem:[#allocation2 + $0x2c8] sm:$0xff]  ;;  %v180_v16 = vld [vmem:[#allocation2 + $0x310] sm:$0xff] }
  0xd1   :  { %v1925_v36 = vpack.c.bf16 %v1117_v26, %v1116_v25  ;;  %537 = vmatmul.mubr.f32.gmra.mrb[14].mxu1 %v131_v33  ;;  %v187_v20 = vld [vmem:[#allocation2 + $0x348] sm:$0xff]  ;;  %v177_v21 = vld [vmem:[#allocation2 + $0x2f8] sm:$0xff]  ;;  %v2235_v26 = vmov 0.0   ;;  %v1306_v57 = vld [vmem:[#allocation8] sm:$0xff] }
  0xd2   :  { %823 = vmatmul.mubr.f32.gmra.mrb[2].mxu0 %v93_v39  ;;  %v121_v39 = vld [vmem:[#allocation2 + $0x138] sm:$0xff]  ;;  %542 = vmatprep.mubr.f32.mxu1 %v139_v35  ;;  %v191_v25 = vld [vmem:[#allocation2 + $0x368] sm:$0xff] }
  0xd3   :  { %828 = vmatprep.mubr.f32.mxu0 %v101_v43  ;;  %1878 = vmatpush1.bf16.msra.mxu0 %v1877_v40  ;;  %v1893_v40 = vpack.c.bf16 %v408_v30, %v406_v29  ;;  %v129_v43 = vld [vmem:[#allocation2 + $0x178] sm:$0xff]  ;;  %v102_v29 = vld [vmem:[#allocation2 + $0xa0] sm:$0xff]  ;;  %v123_v35 = vld [vmem:[#allocation2 + $0x148] sm:$0xff] }
  0xd4   :  { %1880 = vmatprep.subr.bf16.mxu0 %v1879_v44  ;;  %v1895_v44 = vpack.c.bf16 %v413_v32, %v411_v31  ;;  %1924 = vmatprep.subr.bf16.mxu1 %v1923_v34  ;;  %v185_v22 = vld [vmem:[#allocation2 + $0x338] sm:$0xff]  ;;  %v1136_v31 = vld [vmem:[#allocation7 + $0xf0] sm:$0xff]  ;;  %v1307_v58 = vld [vmem:[#allocation8 + $0x8] sm:$0xff] }
  0xd5   :  { %1926 = vmatpush3.bf16.msra.mxu1 %v1925_v36  ;;  %v109_v30 = vld [vmem:[#allocation2 + $0xd8] sm:$0xff]  ;;  %v116_v34 = vld [vmem:[#allocation2 + $0x110] sm:$0xff]  ;;  %v130_v36 = vld [vmem:[#allocation2 + $0x180] sm:$0xff] }
  0xd6   :  { %829 = vmatmul.mubr.f32.gmra.mrb[4].mxu0 %v100_v55  ;;  %v136_v55 = vld [vmem:[#allocation2 + $0x1b0] sm:$0xff]  ;;  %543 = vmatmul.mubr.f32.gmra.mrb[16].mxu1 %v138_v49  ;;  %v1137_v32 = vld [vmem:[#allocation7 + $0xf8] sm:$0xff] }
  0xd7   :  { %834 = vmatprep.mubr.f32.mxu0 %v108_v59  ;;  %1882 = vmatpush1.bf16.msra.mxu0 %v1881_v56  ;;  %v1899_v56 = vpack.c.bf16 %v417_v48, %v415_v47  ;;  %v145_v59 = vld [vmem:[#allocation2 + $0x1f8] sm:$0xff]  ;;  %v1931_v33 = vpack.c.bf16 %v1137_v32, %v1136_v31 }
  0xd8   :  { %1884 = vmatprep.subr.bf16.mxu0 %v1883_v60  ;;  %548 = vmatprep.mubr.f32.mxu1 %v146_v51  ;;  %v153_v60 = vld [vmem:[#allocation2 + $0x238] sm:$0xff] }
  0xd9   :  { %1928 = vmatprep.subr.bf16.mxu1 %v1927_v50  ;;  %v1121_v47 = vld [vmem:[#allocation7 + $0x78] sm:$0xff] }
  0xda   :  { %835 = vmatmul.mubr.f32.gmra.mrb[6].mxu0 %v107_v7  ;;  %1930 = vmatpush3.bf16.msra.mxu1 %v1929_v52  ;;  %v157_v7 = vld [vmem:[#allocation2 + $0x258] sm:$0xff]  ;;  %v1933_v48 = vpack.c.bf16 %v1121_v47, %v1120_v46  ;;  %v1310_v46 = vld [vmem:[#allocation8 + $0x20] sm:$0xff]  ;;  %v1311_v47 = vld [vmem:[#allocation8 + $0x28] sm:$0xff] }
  0xdb   :  { %840 = vmatprep.mubr.f32.mxu0 %v115_v11  ;;  %1886 = vmatpush1.bf16.msra.mxu0 %v1885_v8  ;;  %v166_v8 = vld [vmem:[#allocation2 + $0x2a0] sm:$0xff]  ;;  %v164_v11 = vld [vmem:[#allocation2 + $0x290] sm:$0xff] }
  0xdc   :  { %1888 = vmatprep.subr.bf16.mxu0 %v1887_v12  ;;  %549 = vmatmul.mubr.f32.gmra.mrb[18].mxu1 %v145_v59  ;;  %v173_v12 = vld [vmem:[#allocation2 + $0x2d8] sm:$0xff]  ;;  %v1935_v59 = vpack.c.bf16 %v1307_v58, %v1306_v57  ;;  %v1943_v58 = vpack.c.bf16 %v1311_v47, %v1310_v46 }
  0xdd   :  { %554 = vmatprep.mubr.f32.mxu1 %v153_v60  ;;  %1932 = vmatprep.subr.bf16.mxu1 %v1931_v33 }
  0xde   :  { %841 = vmatmul.mubr.f32.gmra.mrb[8].mxu0 %v114_v23  ;;  %v184_v23 = vld [vmem:[#allocation2 + $0x330] sm:$0xff]  ;;  %1934 = vmatpush3.bf16.msra.mxu1 %v1933_v48 }
  0xdf   :  { %846 = vmatprep.mubr.f32.mxu0 %v122_v27  ;;  %1890 = vmatpush1.bf16.msra.mxu0 %v1889_v24  ;;  %v192_v24 = vld [vmem:[#allocation2 + $0x370] sm:$0xff] }
  0xe0   :  { %1892 = vmatprep.subr.bf16.mxu0 %v1891_v28  ;;  %555 = vmatmul.mubr.f32.gmra.mrb[20].mxu1 %v152_v0  ;;  %v88_v27 = vld [vmem:[#allocation2 + $0x30] sm:$0xff]  ;;  %v95_v28 = vld [vmem:[#allocation2 + $0x68] sm:$0xff] }
  0xe1   :  { %560 = vmatprep.mubr.f32.mxu1 %v160_v1  ;;  %1936 = vmatprep.subr.bf16.mxu1 %v1935_v59 }
  0xe2   :  { %847 = vmatmul.mubr.f32.gmra.mrb[10].mxu0 %v121_v39  ;;  %v151_v39 = vld [vmem:[#allocation2 + $0x228] sm:$0xff] }
  0xe3   :  { %852 = vmatprep.mubr.f32.mxu0 %v129_v43  ;;  %1894 = vmatpush1.bf16.msra.mxu0 %v1893_v40  ;;  %v158_v40 = vld [vmem:[#allocation2 + $0x260] sm:$0xff]  ;;  %v179_v43 = vld [vmem:[#allocation2 + $0x308] sm:$0xff] }
  0xe4   :  { %1896 = vmatprep.subr.bf16.mxu0 %v1895_v44  ;;  %561 = vmatmul.mubr.f32.gmra.mrb[22].mxu1 %v159_v4  ;;  %v186_v44 = vld [vmem:[#allocation2 + $0x340] sm:$0xff] }
  0xe5   :  { %566 = vmatprep.mubr.f32.mxu1 %v167_v5 }
  0xe6   :  { %853 = vmatmul.mubr.f32.gmra.mrb[12].mxu0 %v128_v53 }
  0xe7   :  { %858 = vmatprep.mubr.f32.mxu0 %v136_v55  ;;  %1898 = vmatpush1.bf16.msra.mxu0 %v1897_v54 }
  0xe8   :  { %1900 = vmatprep.subr.bf16.mxu0 %v1899_v56  ;;  %567 = vmatmul.mubr.f32.gmra.mrb[24].mxu1 %v166_v8 }
  0xe9   :  { %572 = vmatprep.mubr.f32.mxu1 %v174_v9 }
  0xea   :  { %859 = vmatmul.mubr.f32.gmra.mrb[14].mxu0 %v135_v61 }
  0xeb   :  { %864 = vmatprep.mubr.f32.mxu0 %v143_v63  ;;  %1902 = vmatpush1.bf16.msra.mxu0 %v1901_v62 }
  0xec   :  { %573 = vmatmul.mubr.f32.gmra.mrb[26].mxu1 %v173_v12 }
  0xed   :  { %578 = vmatprep.mubr.f32.mxu1 %v181_v13 }
  0xee   :  { %865 = vmatmul.mubr.f32.gmra.mrb[16].mxu0 %v142_v2 }
  0xef   :  { %870 = vmatprep.mubr.f32.mxu0 %v150_v3 }
  0xf0   :  { %579 = vmatmul.mubr.f32.gmra.mrb[28].mxu1 %v180_v16  ;;  %v420_v16 = vlaneseq }
  0xf1   :  { %584 = vmatprep.mubr.f32.mxu1 %v188_v17 }
  0xf2   :  { %871 = vmatmul.mubr.f32.gmra.mrb[18].mxu0 %v149_v6 }
  0xf3   :  { %876 = vmatprep.mubr.f32.mxu0 %v157_v7 }
  0xf4   :  { %585 = vmatmul.mubr.f32.gmra.mrb[30].mxu1 %v187_v20 }
  0xf6   :  { %877 = vmatmul.mubr.f32.gmra.mrb[20].mxu0 %v156_v10 }
  0xf7   :  { %882 = vmatprep.mubr.f32.mxu0 %v164_v11 }
  0xfa   :  { %883 = vmatmul.mubr.f32.gmra.mrb[22].mxu0 %v163_v14 }
  0xfb   :  { %888 = vmatprep.mubr.f32.mxu0 %v171_v15 }
  0xfe   :  { %889 = vmatmul.mubr.f32.gmra.mrb[24].mxu0 %v170_v18 }
  0xff   :  { %894 = vmatprep.mubr.f32.mxu0 %v178_v19  ;;  %v421_v19 = vshrl.u32 %v420_v16, 7 }
 0x102   :  { %895 = vmatmul.mubr.f32.gmra.mrb[26].mxu0 %v177_v21 }
 0x103   :  { %900 = vmatprep.mubr.f32.mxu0 %v185_v22  ;;  %v422_v22 = vsub.s32 0, %v421_v19 }
 0x106   :  { %901 = vmatmul.mubr.f32.gmra.mrb[28].mxu0 %v184_v23  ;;  %v418_v23 = vld [vmem:[%s2489_s2] sm:$0x3] }
 0x107   :  { %906 = vmatprep.mubr.f32.mxu0 %v192_v24  ;;  %v426_v24 = vsub.s32 1, %v421_v19  ;;  %v1313_v19 = vld [vmem:[#allocation8 + $0x38] sm:$0xff] }
 0x10a   :  { %907 = vmatmul.mubr.f32.gmra.mrb[30].mxu0 %v191_v25  ;;  %v2386_v25 = vrot.slane %v418_v23, %v422_v22 }
 0x10b   :  { %977 = vmatprep.mubr.f32.mxu0 %v2235_v26 }
 0x10e   :  { %978 = vmatmul.mubr.f32.vlgmr.msra.gmra.mrb[0].mxu0 %v88_v27 }
 0x10f   :  { %983 = vmatprep.mubr.f32.mxu0 %v2235_v26 }
 0x112   :  { %984 = vmatmul.mubr.f32.gmra.mrb[2].mxu0 %v95_v28 }
 0x113   :  { %989 = vmatprep.mubr.f32.mxu0 %v2235_v26 }
 0x116   :  { %990 = vmatmul.mubr.f32.gmra.mrb[4].mxu0 %v102_v29 }
 0x117   :  { %995 = vmatprep.mubr.f32.mxu0 %v2235_v26 }
 0x11a   :  { %996 = vmatmul.mubr.f32.gmra.mrb[6].mxu0 %v109_v30 }
 0x11b   :  { %1001 = vmatprep.mubr.f32.mxu0 %v2235_v26 }
 0x11e   :  { %1002 = vmatmul.mubr.f32.gmra.mrb[8].mxu0 %v116_v34 }
 0x11f   :  { %1007 = vmatprep.mubr.f32.mxu0 %v2235_v26 }
 0x122   :  { %1008 = vmatmul.mubr.f32.gmra.mrb[10].mxu0 %v123_v35  ;;  %v1308_v35 = vld [vmem:[#allocation8 + $0x10] sm:$0xff] }
 0x123   :  { %1013 = vmatprep.mubr.f32.mxu0 %v2235_v26 }
 0x126   :  { %1014 = vmatmul.mubr.f32.gmra.mrb[12].mxu0 %v130_v36  ;;  %v1309_v36 = vld [vmem:[#allocation8 + $0x18] sm:$0xff] }
 0x127   :  { %1019 = vmatprep.mubr.f32.mxu0 %v2235_v26 }
 0x12a   :  { %1020 = vmatmul.mubr.f32.gmra.mrb[14].mxu0 %v137_v37 }
 0x12b   :  { %1025 = vmatprep.mubr.f32.mxu0 %v2235_v26 }
 0x12e   :  { %1026 = vmatmul.mubr.f32.gmra.mrb[16].mxu0 %v144_v38 }
 0x12f   :  { %1031 = vmatprep.mubr.f32.mxu0 %v2235_v26 }
 0x132   :  { %1032 = vmatmul.mubr.f32.gmra.mrb[18].mxu0 %v151_v39 }
 0x133   :  { %1037 = vmatprep.mubr.f32.mxu0 %v2235_v26 }
 0x136   :  { %1038 = vmatmul.mubr.f32.gmra.mrb[20].mxu0 %v158_v40 }
 0x137   :  { %1043 = vmatprep.mubr.f32.mxu0 %v2235_v26 }
 0x13a   :  { %1044 = vmatmul.mubr.f32.gmra.mrb[22].mxu0 %v165_v41 }
 0x13b   :  { %1049 = vmatprep.mubr.f32.mxu0 %v2235_v26 }
 0x13e   :  { %1050 = vmatmul.mubr.f32.gmra.mrb[24].mxu0 %v172_v42 }
 0x13f   :  { %1055 = vmatprep.mubr.f32.mxu0 %v2235_v26 }
 0x142   :  { %1056 = vmatmul.mubr.f32.gmra.mrb[26].mxu0 %v179_v43  ;;  %v1939_v43 = vpack.c.bf16 %v1309_v36, %v1308_v35 }
 0x143   :  { %1061 = vmatprep.mubr.f32.mxu0 %v2235_v26 }
 0x146   :  { %1062 = vmatmul.mubr.f32.gmra.mrb[28].mxu0 %v186_v44 }
 0x147   :  { %1067 = vmatprep.mubr.f32.mxu0 %v2235_v26  ;;  %v2388_v26 = vrot.slane %v418_v23, %v426_v24 }
 0x14a   :  { %1068 = vmatmul.mubr.f32.gmra.mrb[30].mxu0 %v193_v45 }
 0x187   :  { %v496_v49 = vpop.f32.mrb[0].mxu1 }
 0x188   :  { %v498_v50 = vpop.f32.mrb[1].mxu1  ;;  %v497_v27 = vadd.f32 %v496_v49, %v2386_v25 }
 0x189   :  { %v499_v28 = vadd.f32 %v498_v50, %v2388_v26 }
 0x18b   :  { %v502_v51 = vpop.f32.mrb[2].mxu1 }
 0x18c   :  { %v504_v52 = vpop.f32.mrb[3].mxu1  ;;  %v503_v32 = vadd.f32 %v502_v51, %v2386_v25 }
 0x18d   :  { %v505_v34 = vadd.f32 %v504_v52, %v2388_v26 }
 0x18f   :  { %v508_v53 = vpop.f32.mrb[4].mxu1 }
 0x190   :  { %v510_v54 = vpop.f32.mrb[5].mxu1  ;;  %v509_v42 = vadd.f32 %v508_v53, %v2386_v25 }
 0x191   :  { %v511_v45 = vadd.f32 %v510_v54, %v2388_v26  ;;  %v1312_v54 = vld [vmem:[#allocation8 + $0x30] sm:$0xff] }
 0x193   :  { %v2331_v55 = vpop.f32.mrb[6].mxu1 }
 0x194   :  { %v2333_v56 = vpop.f32.mrb[7].mxu1  ;;  %v515_v57 = vadd.f32 %v2331_v55, %v2386_v25  ;;  %v1947_v55 = vpack.c.bf16 %v1313_v19, %v1312_v54 }
 0x195   :  { %v517_v16 = vadd.f32 %v2333_v56, %v2388_v26  ;;  %v1314_v56 = vld [vmem:[#allocation8 + $0x40] sm:$0xff] }
 0x197   :  { %v2335_v60 = vpop.f32.mrb[8].mxu1 }
 0x198   :  { %v2337_v61 = vpop.f32.mrb[9].mxu1 }
 0x19b   :  { %v2339_v62 = vpop.f32.mrb[10].mxu1 }
 0x19c   :  { %v2341_v63 = vpop.f32.mrb[11].mxu1 }
 0x19f   :  { %v2343_v0 = vpop.f32.mrb[12].mxu1 }
 0x1a0   :  { %v2345_v1 = vpop.f32.mrb[13].mxu1 }
 0x1a4   :  { %v2347_v2 = vpop.f32.mrb[14].mxu1 }
 0x1a5   :  { %v2349_v3 = vpop.f32.mrb[15].mxu1 }
 0x1a9   :  { %v2351_v4 = vpop.f32.mrb[16].mxu1 }
 0x1aa   :  { %v2353_v5 = vpop.f32.mrb[17].mxu1 }
 0x1ab   :  { %v547_v19 = vadd.f32 %v2353_v5, %v2388_v26 }
 0x1af   :  { %v2355_v6 = vpop.f32.mrb[18].mxu1 }
 0x1b0   :  { %v2357_v7 = vpop.f32.mrb[19].mxu1 }
 0x1b3   :  { %v2359_v8 = vpop.f32.mrb[20].mxu1 }
 0x1b4   :  { %v2361_v9 = vpop.f32.mrb[21].mxu1 }
 0x1b7   :  { %v2363_v10 = vpop.f32.mrb[22].mxu1 }
 0x1b8   :  { %v2365_v11 = vpop.f32.mrb[23].mxu1 }
 0x1bb   :  { %v2367_v12 = vpop.f32.mrb[24].mxu1 }
 0x1bc   :  { %v2369_v13 = vpop.f32.mrb[25].mxu1 }
 0x1bf   :  { %v2371_v14 = vpop.f32.mrb[26].mxu1 }
 0x1c0   :  { %v2373_v15 = vpop.f32.mrb[27].mxu1 }
 0x1c3   :  { %v2375_v17 = vpop.f32.mrb[28].mxu1 }
 0x1c4   :  { %v2377_v18 = vpop.f32.mrb[29].mxu1 }
 0x1c7   :  { %v2379_v20 = vpop.f32.mrb[30].mxu1 }
 0x1c8   :  { %v2381_v21 = vpop.f32.mrb[31].mxu1 }
 0x1e1   :  { %v979_v29 = vpop.f32.mrb[0].mxu0 }
 0x1e2   :  { %v1968_v30 = vadd.f32 %v979_v29, %v497_v27  ;;  %v981_v31 = vpop.f32.mrb[1].mxu0 }
 0x1e3   :  { %v1970_v33 = vadd.f32 %v981_v31, %v499_v28  ;;  %v521_v28 = vadd.f32 %v2335_v60, %v2386_v25  ;;  %v1315_v31 = vld [vmem:[#allocation8 + $0x48] sm:$0xff] }
 0x1e4   :  { %v1074_v39 = vmul.f32 %v1968_v30, %v1968_v30  ;;  %v523_v30 = vadd.f32 %v2337_v61, %v2388_v26  ;;  %v1951_v60 = vpack.c.bf16 %v1315_v31, %v1314_v56  ;;  %v557_v56 = vadd.f32 %v2359_v8, %v2386_v25 }
 0x1e5   :  { %v1075_v37 = vmul.f32 %v1970_v33, %v1970_v33  ;;  %v985_v38 = vpop.f32.mrb[2].mxu0 }
 0x1e6   :  { %v1972_v40 = vadd.f32 %v985_v38, %v503_v32  ;;  %v987_v41 = vpop.f32.mrb[3].mxu0 }
 0x1e7   :  { %v1974_v44 = vadd.f32 %v987_v41, %v505_v34  ;;  %1209 = vmatprep.mubr.f32.mxu1 %v1075_v37  ;;  %v527_v37 = vadd.f32 %v2339_v62, %v2386_v25  ;;  %v535_v62 = vadd.f32 %v2345_v1, %v2388_v26 }
 0x1e8   :  { %1210 = vmatmul.mubr.f32.vlgmr.msra.gmra.mrb[32].mxu1 %v1074_v39  ;;  %v1076_v50 = vmul.f32 %v1972_v40, %v1972_v40  ;;  %v529_v39 = vadd.f32 %v2341_v63, %v2388_v26 }
 0x1e9   :  { %v1077_v48 = vmul.f32 %v1974_v44, %v1974_v44  ;;  %v991_v49 = vpop.f32.mrb[4].mxu0  ;;  %1938 = vmatpush3.bf16.msra.mxu1 %v1935_v59  ;;  %v533_v44 = vadd.f32 %v2343_v0, %v2386_v25  ;;  %v541_v0 = vadd.f32 %v2349_v3, %v2388_v26 }
 0x1ea   :  { %v1976_v51 = vadd.f32 %v991_v49, %v509_v42  ;;  %v993_v52 = vpop.f32.mrb[5].mxu0  ;;  %1940 = vmatprep.subr.bf16.mxu1 %v1939_v43 }
 0x1eb   :  { %v1978_v53 = vadd.f32 %v993_v52, %v511_v45  ;;  %1214 = vmatprep.mubr.f32.mxu1 %v1077_v48 }
 0x1ec   :  { %1215 = vmatmul.mubr.f32.gmra.mrb[34].mxu1 %v1076_v50  ;;  %v1078_v59 = vmul.f32 %v1976_v51, %v1976_v51  ;;  %v539_v50 = vadd.f32 %v2347_v2, %v2386_v25 }
 0x1ed   :  { %v1079_v22 = vmul.f32 %v1978_v53, %v1978_v53  ;;  %v997_v23 = vpop.f32.mrb[6].mxu0  ;;  %1942 = vmatpush3.bf16.msra.mxu1 %v1939_v43 }
 0x1ee   :  { %v1980_v24 = vadd.f32 %v997_v23, %v515_v57  ;;  %v999_v27 = vpop.f32.mrb[7].mxu0  ;;  %1944 = vmatprep.subr.bf16.mxu1 %v1943_v58 }
 0x1ef   :  { %v1982_v29 = vadd.f32 %v999_v27, %v517_v16  ;;  %1219 = vmatprep.mubr.f32.mxu1 %v1079_v22  ;;  %v545_v16 = vadd.f32 %v2351_v4, %v2386_v25 }
 0x1f0   :  { %1220 = vmatmul.mubr.f32.gmra.mrb[36].mxu1 %v1078_v59  ;;  %v1080_v34 = vmul.f32 %v1980_v24, %v1980_v24  ;;  %v551_v24 = vadd.f32 %v2355_v6, %v2386_v25 }
 0x1f1   :  { %v1081_v32 = vmul.f32 %v1982_v29, %v1982_v29  ;;  %v1003_v33 = vpop.f32.mrb[8].mxu0  ;;  %1946 = vmatpush3.bf16.msra.mxu1 %v1943_v58 }
 0x1f2   :  { %v1984_v35 = vadd.f32 %v1003_v33, %v521_v28  ;;  %v1005_v36 = vpop.f32.mrb[9].mxu0  ;;  %1948 = vmatprep.subr.bf16.mxu1 %v1947_v55  ;;  %v553_v28 = vadd.f32 %v2357_v7, %v2388_v26 }
 0x1f3   :  { %v1986_v38 = vadd.f32 %v1005_v36, %v523_v30  ;;  %1224 = vmatprep.mubr.f32.mxu1 %v1081_v32  ;;  %v559_v32 = vadd.f32 %v2361_v9, %v2388_v26  ;;  %v563_v36 = vadd.f32 %v2363_v10, %v2386_v25 }
 0x1f4   :  { %1225 = vmatmul.mubr.f32.gmra.mrb[38].mxu1 %v1080_v34  ;;  %v1082_v41 = vmul.f32 %v1984_v35, %v1984_v35 }
 0x1f5   :  { %v1083_v61 = vmul.f32 %v1986_v38, %v1986_v38  ;;  %v1009_v40 = vpop.f32.mrb[10].mxu0  ;;  %1950 = vmatpush3.bf16.msra.mxu1 %v1947_v55 }
 0x1f6   :  { %v1988_v42 = vadd.f32 %v1009_v40, %v527_v37  ;;  %v1011_v43 = vpop.f32.mrb[11].mxu0  ;;  %1952 = vmatprep.subr.bf16.mxu1 %v1951_v60  ;;  %v569_v40 = vadd.f32 %v2367_v12, %v2386_v25 }
 0x1f7   :  { %v1990_v45 = vadd.f32 %v1011_v43, %v529_v39  ;;  %1229 = vmatprep.mubr.f32.mxu1 %v1083_v61 }
 0x1f8   :  { %1230 = vmatmul.mubr.f32.gmra.mrb[40].mxu1 %v1082_v41  ;;  %v1084_v63 = vmul.f32 %v1988_v42, %v1988_v42  ;;  %v571_v42 = vadd.f32 %v2369_v13, %v2388_v26 }
 0x1f9   :  { %v1085_v46 = vmul.f32 %v1990_v45, %v1990_v45  ;;  %v1015_v47 = vpop.f32.mrb[12].mxu0  ;;  %1954 = vmatpush3.bf16.msra.mxu1 %v1951_v60  ;;  %v565_v60 = vadd.f32 %v2365_v11, %v2388_v26 }
 0x1fa   :  { %v1992_v48 = vadd.f32 %v1015_v47, %v533_v44  ;;  %v1017_v49 = vpop.f32.mrb[13].mxu0  ;;  %v577_v47 = vadd.f32 %v2373_v15, %v2388_v26 }
 0x1fb   :  { %v1994_v51 = vadd.f32 %v1017_v49, %v535_v62  ;;  %1234 = vmatprep.mubr.f32.mxu1 %v1085_v46  ;;  %v575_v62 = vadd.f32 %v2371_v14, %v2386_v25 }
 0x1fc   :  { %1235 = vmatmul.mubr.f32.gmra.mrb[42].mxu1 %v1084_v63  ;;  %v1086_v58 = vmul.f32 %v1992_v48, %v1992_v48 }
 0x1fd   :  { %v1087_v52 = vmul.f32 %v1994_v51, %v1994_v51  ;;  %v1021_v57 = vpop.f32.mrb[14].mxu0 }
 0x1fe   :  { %v1996_v1 = vadd.f32 %v1021_v57, %v539_v50  ;;  %v1023_v53 = vpop.f32.mrb[15].mxu0  ;;  %v581_v50 = vadd.f32 %v2375_v17, %v2386_v25 }
 0x1ff   :  { %v1998_v54 = vadd.f32 %v1023_v53, %v541_v0  ;;  %1239 = vmatprep.mubr.f32.mxu1 %v1087_v52  ;;  %v583_v0 = vadd.f32 %v2377_v18, %v2388_v26 }
 0x200   :  { %1240 = vmatmul.mubr.f32.gmra.mrb[44].mxu1 %v1086_v58  ;;  %v1088_v23 = vmul.f32 %v1996_v1, %v1996_v1  ;;  %v587_v1 = vadd.f32 %v2379_v20, %v2386_v25  ;;  %v1317_v20 = vld [vmem:[#allocation8 + $0x58] sm:$0xff] }
 0x201   :  { %v1089_v2 = vmul.f32 %v1998_v54, %v1998_v54  ;;  %v1027_v22 = vpop.f32.mrb[16].mxu0 }
 0x202   :  { %v2000_v59 = vadd.f32 %v1027_v22, %v545_v16  ;;  %v1029_v3 = vpop.f32.mrb[17].mxu0  ;;  %v589_v16 = vadd.f32 %v2381_v21, %v2388_v26  ;;  %v1319_v21 = vld [vmem:[#allocation8 + $0x68] sm:$0xff] }
 0x203   :  { %v2002_v27 = vadd.f32 %v1029_v3, %v547_v19  ;;  %1244 = vmatprep.mubr.f32.mxu1 %v1089_v2  ;;  %v1316_v3 = vld [vmem:[#allocation8 + $0x50] sm:$0xff] }
 0x204   :  { %1245 = vmatmul.mubr.f32.gmra.mrb[46].mxu1 %v1088_v23  ;;  %v1090_v29 = vmul.f32 %v2000_v59, %v2000_v59  ;;  %v1955_v25 = vpack.c.bf16 %v1317_v20, %v1316_v3 }
 0x205   :  { %v1091_v4 = vmul.f32 %v2002_v27, %v2002_v27  ;;  %v1033_v55 = vpop.f32.mrb[18].mxu0  ;;  %v1320_v27 = vld [vmem:[#allocation8 + $0x70] sm:$0xff] }
 0x206   :  { %v2004_v30 = vadd.f32 %v1033_v55, %v551_v24  ;;  %v1035_v5 = vpop.f32.mrb[19].mxu0  ;;  %1956 = vmatprep.subr.bf16.mxu1 %v1955_v25  ;;  %v1318_v24 = vld [vmem:[#allocation8 + $0x60] sm:$0xff] }
 0x207   :  { %v2006_v31 = vadd.f32 %v1035_v5, %v553_v28  ;;  %1249 = vmatprep.mubr.f32.mxu1 %v1091_v4  ;;  %1958 = vmatpush3.bf16.msra.mxu1 %v1955_v25  ;;  %v1959_v26 = vpack.c.bf16 %v1319_v21, %v1318_v24  ;;  %v1321_v28 = vld [vmem:[#allocation8 + $0x78] sm:$0xff] }
 0x208   :  { %1250 = vmatmul.mubr.f32.gmra.mrb[48].mxu1 %v1090_v29  ;;  %v1092_v34 = vmul.f32 %v2004_v30, %v2004_v30  ;;  %v1963_v4 = vpack.c.bf16 %v1321_v28, %v1320_v27  ;;  %v2451_v29 = vld [vmem:[%s2491_s4] ss:$0 sm:$0xff] }
 0x209   :  { %v1093_v6 = vmul.f32 %v2006_v31, %v2006_v31  ;;  %v1039_v33 = vpop.f32.mrb[20].mxu0  ;;  %1960 = vmatprep.subr.bf16.mxu1 %v1959_v26 }
 0x20a   :  { %v2008_v35 = vadd.f32 %v1039_v33, %v557_v56  ;;  %v1041_v7 = vpop.f32.mrb[21].mxu0 }
 0x20b   :  { %v2010_v37 = vadd.f32 %v1041_v7, %v559_v32  ;;  %1254 = vmatprep.mubr.f32.mxu1 %v1093_v6  ;;  %1962 = vmatpush3.bf16.msra.mxu1 %v1959_v26 }
 0x20c   :  { %1255 = vmatmul.mubr.f32.gmra.mrb[50].mxu1 %v1092_v34  ;;  %v1094_v39 = vmul.f32 %v2008_v35, %v2008_v35  ;;  %1964 = vmatprep.subr.bf16.mxu1 %v1963_v4 }
 0x20d   :  { %v1095_v8 = vmul.f32 %v2010_v37, %v2010_v37  ;;  %v1045_v38 = vpop.f32.mrb[22].mxu0 }
 0x20e   :  { %v2012_v61 = vadd.f32 %v1045_v38, %v563_v36  ;;  %v1047_v9 = vpop.f32.mrb[23].mxu0 }
 0x20f   :  { %v2014_v41 = vadd.f32 %v1047_v9, %v565_v60  ;;  %1259 = vmatprep.mubr.f32.mxu1 %v1095_v8  ;;  %1966 = vmatpush3.bf16.msra.mxu1 %v1963_v4 }
 0x210   :  { %1260 = vmatmul.mubr.f32.gmra.mrb[52].mxu1 %v1094_v39  ;;  %v1096_v44 = vmul.f32 %v2012_v61, %v2012_v61 }
 0x211   :  { %v1097_v10 = vmul.f32 %v2014_v41, %v2014_v41  ;;  %v1051_v43 = vpop.f32.mrb[24].mxu0 }
 0x212   :  { %v2016_v45 = vadd.f32 %v1051_v43, %v569_v40  ;;  %v1053_v11 = vpop.f32.mrb[25].mxu0 }
 0x213   :  { %v2018_v46 = vadd.f32 %v1053_v11, %v571_v42  ;;  %1264 = vmatprep.mubr.f32.mxu1 %v1097_v10 }
 0x214   :  { %1265 = vmatmul.mubr.f32.gmra.mrb[54].mxu1 %v1096_v44  ;;  %v1098_v48 = vmul.f32 %v2016_v45, %v2016_v45 }
 0x215   :  { %v1099_v12 = vmul.f32 %v2018_v46, %v2018_v46  ;;  %v1057_v63 = vpop.f32.mrb[26].mxu0 }
 0x216   :  { %v2020_v49 = vadd.f32 %v1057_v63, %v575_v62  ;;  %v1059_v13 = vpop.f32.mrb[27].mxu0 }
 0x217   :  { %v2022_v51 = vadd.f32 %v1059_v13, %v577_v47  ;;  %1269 = vmatprep.mubr.f32.mxu1 %v1099_v12 }
 0x218   :  { %1270 = vmatmul.mubr.f32.gmra.mrb[56].mxu1 %v1098_v48  ;;  %v1100_v57 = vmul.f32 %v2020_v49, %v2020_v49 }
 0x219   :  { %v1101_v14 = vmul.f32 %v2022_v51, %v2022_v51  ;;  %v1063_v52 = vpop.f32.mrb[28].mxu0 }
 0x21a   :  { %v2024_v58 = vadd.f32 %v1063_v52, %v581_v50  ;;  %v1065_v15 = vpop.f32.mrb[29].mxu0 }
 0x21b   :  { %v2026_v53 = vadd.f32 %v1065_v15, %v583_v0  ;;  %1274 = vmatprep.mubr.f32.mxu1 %v1101_v14 }
 0x21c   :  { %1275 = vmatmul.mubr.f32.gmra.mrb[58].mxu1 %v1100_v57  ;;  %v1102_v19 = vmul.f32 %v2024_v58, %v2024_v58 }
 0x21d   :  { %v1103_v17 = vmul.f32 %v2026_v53, %v2026_v53  ;;  %v1069_v54 = vpop.f32.mrb[30].mxu0 }
 0x21e   :  { %v2028_v2 = vadd.f32 %v1069_v54, %v587_v1  ;;  %v1071_v18 = vpop.f32.mrb[31].mxu0 }
 0x21f   :  { %v2030_v22 = vadd.f32 %v1071_v18, %v589_v16  ;;  %1279 = vmatprep.mubr.f32.mxu1 %v1103_v17 }
 0x220   :  { %1280 = vmatmul.mubr.f32.gmra.mrb[60].mxu1 %v1102_v19  ;;  %v1104_v59 = vmul.f32 %v2028_v2, %v2028_v2 }
 0x221   :  { %v1105_v23 = vmul.f32 %v2030_v22, %v2030_v22 }
 0x223   :  { %1284 = vmatprep.mubr.f32.mxu1 %v1105_v23 }
 0x224   :  { %1285 = vmatmul.mubr.f32.gmra.mrb[62].mxu1 %v1104_v59 }
 0x2bb   :  { %v1543_v55 = vpop.f32.mrb[32].mxu1 }
 0x2bc   :  { %v1544_v30 = vpop.f32.mrb[33].mxu1 }
 0x2bd   :  { %v1545_v5 = vadd.f32 %v1544_v30, %v1543_v55 }
 0x2bf   :  { %v1212_v56 = vadd.f32 %v1545_v5, %v2451_v29  ;;  %v1546_v31 = vpop.f32.mrb[34].mxu1 }
 0x2c0   :  { %v1547_v32 = vpop.f32.mrb[35].mxu1 }
 0x2c1   :  { %v1290_v6 = vmul.f32 %v1212_v56, %v1212_v56  ;;  %v1548_v33 = vadd.f32 %v1547_v32, %v1546_v31 }
 0x2c3   :  { %v1217_v34 = vadd.f32 %v1548_v33, %v2451_v29  ;;  %v1549_v35 = vpop.f32.mrb[36].mxu1  ;;  %1655 = vmatprep.mubr.f32.mxu1 %v1290_v6 }
 0x2c4   :  { %v1550_v7 = vpop.f32.mrb[37].mxu1 }
 0x2c5   :  { %v1291_v36 = vmul.f32 %v1217_v34, %v1217_v34  ;;  %v1551_v37 = vadd.f32 %v1550_v7, %v1549_v35 }
 0x2c7   :  { %v1222_v60 = vadd.f32 %v1551_v37, %v2451_v29  ;;  %v1552_v8 = vpop.f32.mrb[38].mxu1  ;;  %1656 = vmatmul.mubr.f32.vlgmr.msra.gmra.mrb[64].mxu1 %v1291_v36 }
 0x2c8   :  { %v1553_v38 = vpop.f32.mrb[39].mxu1 }
 0x2c9   :  { %v1292_v39 = vmul.f32 %v1222_v60, %v1222_v60  ;;  %v1554_v61 = vadd.f32 %v1553_v38, %v1552_v8 }
 0x2cb   :  { %v1227_v9 = vadd.f32 %v1554_v61, %v2451_v29  ;;  %v1555_v40 = vpop.f32.mrb[40].mxu1  ;;  %1658 = vmatprep.mubr.f32.mxu1 %v1292_v39  ;;  %v1510_v61 = vld [vmem:[%s2493_s6] ss:$0 sm:$0xff]  ;;  %s2236_s6 = smov [#allocation10]  }
 0x2cc   :  { %v1556_v41 = vpop.f32.mrb[41].mxu1  ;;  %s1495_s8 = sshll.u32 %s2236_s6, 4  ;;  %s1496_s8 = int_to_ptr.vmem [resolvable:$true] %s1495_s8 }
 0x2cd   :  { %v1293_v42 = vmul.f32 %v1227_v9, %v1227_v9  ;;  %v1557_v10 = vadd.f32 %v1556_v41, %v1555_v40  ;;  %s2195_s9 = scalar_lea.vmem %s1496_s8, 2048  ;;  %p2200_p5 = scmp.lt.s32.totalorder %s1496_s8, %s1496_s8 }
 0x2ce   :  { %p2196_p4 = scmp.ne.s32.totalorder %s1496_s8, %s2195_s9  ;;  %p2201_p6 = scmp.lt.s32.totalorder %s2195_s9, %s2195_s9 }
 0x2cf   :  { %v1232_v43 = vadd.f32 %v1557_v10, %v2451_v29  ;;  %v1558_v44 = vpop.f32.mrb[42].mxu1  ;;  %1659 = vmatmul.mubr.f32.gmra.mrb[66].mxu1 %v1293_v42 }
 0x2d0   :  { %v1559_v45 = vpop.f32.mrb[43].mxu1  ;;  %p2202_p7 = por %p2201_p6, %p2200_p5 }
 0x2d1   :  { %v1294_v11 = vmul.f32 %v1232_v43, %v1232_v43  ;;  %v1560_v62 = vadd.f32 %v1559_v45, %v1558_v44 }
 0x2d2   :  { %p2203_p8 = pnand %p2202_p7, %p2196_p4 }
 0x2d3   :  { %v1237_v46 = vadd.f32 %v1560_v62, %v2451_v29  ;;  %v1561_v47 = vpop.f32.mrb[44].mxu1  ;;  %1661 = vmatprep.mubr.f32.mxu1 %v1294_v11 }
 0x2d4   :  { %v1562_v12 = vpop.f32.mrb[45].mxu1 }
 0x2d5   :  { %v1295_v63 = vmul.f32 %v1237_v46, %v1237_v46  ;;  %v1563_v48 = vadd.f32 %v1562_v12, %v1561_v47 }
 0x2d7   :  { %v1242_v49 = vadd.f32 %v1563_v48, %v2451_v29  ;;  %v1564_v13 = vpop.f32.mrb[46].mxu1  ;;  %1662 = vmatmul.mubr.f32.gmra.mrb[68].mxu1 %v1295_v63 }
 0x2d8   :  { %v1565_v50 = vpop.f32.mrb[47].mxu1 }
 0x2d9   :  { %v1296_v51 = vmul.f32 %v1242_v49, %v1242_v49  ;;  %v1566_v0 = vadd.f32 %v1565_v50, %v1564_v13 }
 0x2db   :  { %v1247_v14 = vadd.f32 %v1566_v0, %v2451_v29  ;;  %v1567_v52 = vpop.f32.mrb[48].mxu1  ;;  %1664 = vmatprep.mubr.f32.mxu1 %v1296_v51 }
 0x2dc   :  { %v1568_v57 = vpop.f32.mrb[49].mxu1 }
 0x2dd   :  { %v1297_v58 = vmul.f32 %v1247_v14, %v1247_v14  ;;  %v1569_v15 = vadd.f32 %v1568_v57, %v1567_v52 }
 0x2df   :  { %v1252_v1 = vadd.f32 %v1569_v15, %v2451_v29  ;;  %v1570_v53 = vpop.f32.mrb[50].mxu1  ;;  %1665 = vmatmul.mubr.f32.gmra.mrb[70].mxu1 %v1297_v58 }
 0x2e0   :  { %v1571_v16 = vpop.f32.mrb[51].mxu1 }
 0x2e1   :  { %v1298_v17 = vmul.f32 %v1252_v1, %v1252_v1  ;;  %v1572_v54 = vadd.f32 %v1571_v16, %v1570_v53 }
 0x2e3   :  { %v1257_v19 = vadd.f32 %v1572_v54, %v2451_v29  ;;  %v1573_v2 = vpop.f32.mrb[52].mxu1  ;;  %1667 = vmatprep.mubr.f32.mxu1 %v1298_v17 }
 0x2e4   :  { %v1574_v18 = vpop.f32.mrb[53].mxu1 }
 0x2e5   :  { %v1299_v22 = vmul.f32 %v1257_v19, %v1257_v19  ;;  %v1575_v23 = vadd.f32 %v1574_v18, %v1573_v2 }
 0x2e7   :  { %v1262_v59 = vadd.f32 %v1575_v23, %v2451_v29  ;;  %v1576_v3 = vpop.f32.mrb[54].mxu1  ;;  %1668 = vmatmul.mubr.f32.gmra.mrb[72].mxu1 %v1299_v22 }
 0x2e8   :  { %v1577_v20 = vpop.f32.mrb[55].mxu1 }
 0x2e9   :  { %v1300_v25 = vmul.f32 %v1262_v59, %v1262_v59  ;;  %v1578_v24 = vadd.f32 %v1577_v20, %v1576_v3 }
 0x2eb   :  { %v1267_v21 = vadd.f32 %v1578_v24, %v2451_v29  ;;  %v1579_v26 = vpop.f32.mrb[56].mxu1  ;;  %1670 = vmatprep.mubr.f32.mxu1 %v1300_v25 }
 0x2ec   :  { %v1580_v27 = vpop.f32.mrb[57].mxu1 }
 0x2ed   :  { %v1301_v28 = vmul.f32 %v1267_v21, %v1267_v21  ;;  %v1581_v4 = vadd.f32 %v1580_v27, %v1579_v26 }
 0x2ef   :  { %v1272_v55 = vadd.f32 %v1581_v4, %v2451_v29  ;;  %v1582_v30 = vpop.f32.mrb[58].mxu1  ;;  %1671 = vmatmul.mubr.f32.gmra.mrb[74].mxu1 %v1301_v28 }
 0x2f0   :  { %v1583_v5 = vpop.f32.mrb[59].mxu1 }
 0x2f1   :  { %v1302_v56 = vmul.f32 %v1272_v55, %v1272_v55  ;;  %v1584_v31 = vadd.f32 %v1583_v5, %v1582_v30 }
 0x2f3   :  { %v1277_v32 = vadd.f32 %v1584_v31, %v2451_v29  ;;  %v1585_v6 = vpop.f32.mrb[60].mxu1  ;;  %1673 = vmatprep.mubr.f32.mxu1 %v1302_v56 }
 0x2f4   :  { %v1586_v33 = vpop.f32.mrb[61].mxu1 }
 0x2f5   :  { %v1303_v34 = vmul.f32 %v1277_v32, %v1277_v32  ;;  %v1587_v35 = vadd.f32 %v1586_v33, %v1585_v6 }
 0x2f7   :  { %v1282_v7 = vadd.f32 %v1587_v35, %v2451_v29  ;;  %v1588_v36 = vpop.f32.mrb[62].mxu1  ;;  %1674 = vmatmul.mubr.f32.gmra.mrb[76].mxu1 %v1303_v34 }
 0x2f8   :  { %v1589_v37 = vpop.f32.mrb[63].mxu1 }
 0x2f9   :  { %v1304_v60 = vmul.f32 %v1282_v7, %v1282_v7  ;;  %v1590_v8 = vadd.f32 %v1589_v37, %v1588_v36 }
 0x2fb   :  { %v1287_v38 = vadd.f32 %v1590_v8, %v2451_v29  ;;  %1676 = vmatprep.mubr.f32.mxu1 %v1304_v60 }
 0x2fd   :  { %v1305_v39 = vmul.f32 %v1287_v38, %v1287_v38 }
 0x2ff   :  { %1677 = vmatmul.mubr.f32.gmra.mrb[78].mxu1 %v1305_v39 }
 0x39a   :  { %v1657_v9 = vpop.f32.mrb[64].mxu1 }
 0x39b   :  { %v1401_v40 = vadd.f32 %v1657_v9, %v1510_v61  ;;  %v1395_v41 = vpop.f32.mrb[65].mxu1 }
 0x39c   :  { %v1396_v42 = vadd.f32 %v1510_v61, %v1395_v41 }
 0x39d   :  { %1475 = vst [vmem:[#allocation10 + $0x8] sm:$0xff] %v1401_v40 }
 0x39e   :  { %1474 = vst [vmem:[#allocation10] sm:$0xff] %v1396_v42 }
 0x3a2   :  { %v1660_v10 = vpop.f32.mrb[66].mxu1 }
 0x3a3   :  { %v1411_v43 = vadd.f32 %v1660_v10, %v1510_v61  ;;  %v1405_v44 = vpop.f32.mrb[67].mxu1 }
 0x3a4   :  { %v1406_v45 = vadd.f32 %v1510_v61, %v1405_v44 }
 0x3a5   :  { %1477 = vst [vmem:[#allocation10 + $0x18] sm:$0xff] %v1411_v43 }
 0x3a6   :  { %1476 = vst [vmem:[#allocation10 + $0x10] sm:$0xff] %v1406_v45 }
 0x3aa   :  { %v1663_v29 = vpop.f32.mrb[68].mxu1 }
 0x3ab   :  { %v1421_v11 = vadd.f32 %v1663_v29, %v1510_v61  ;;  %v1415_v62 = vpop.f32.mrb[69].mxu1 }
 0x3ac   :  { %v1416_v46 = vadd.f32 %v1510_v61, %v1415_v62 }
 0x3ad   :  { %1479 = vst [vmem:[#allocation10 + $0x28] sm:$0xff] %v1421_v11 }
 0x3ae   :  { %1478 = vst [vmem:[#allocation10 + $0x20] sm:$0xff] %v1416_v46 }
 0x3b2   :  { %v1666_v47 = vpop.f32.mrb[70].mxu1 }
 0x3b3   :  { %v1431_v12 = vadd.f32 %v1666_v47, %v1510_v61  ;;  %v1425_v63 = vpop.f32.mrb[71].mxu1 }
 0x3b4   :  { %v1426_v48 = vadd.f32 %v1510_v61, %v1425_v63 }
 0x3b5   :  { %1481 = vst [vmem:[#allocation10 + $0x38] sm:$0xff] %v1431_v12 }
 0x3b6   :  { %1480 = vst [vmem:[#allocation10 + $0x30] sm:$0xff] %v1426_v48 }
 0x3ba   :  { %v1669_v49 = vpop.f32.mrb[72].mxu1 }
 0x3bb   :  { %v1441_v13 = vadd.f32 %v1669_v49, %v1510_v61  ;;  %v1435_v50 = vpop.f32.mrb[73].mxu1 }
 0x3bc   :  { %v1436_v51 = vadd.f32 %v1510_v61, %v1435_v50 }
 0x3bd   :  { %1483 = vst [vmem:[#allocation10 + $0x48] sm:$0xff] %v1441_v13 }
 0x3be   :  { %1482 = vst [vmem:[#allocation10 + $0x40] sm:$0xff] %v1436_v51 }
 0x3c2   :  { %v1672_v0 = vpop.f32.mrb[74].mxu1 }
 0x3c3   :  { %v1451_v14 = vadd.f32 %v1672_v0, %v1510_v61  ;;  %v1445_v52 = vpop.f32.mrb[75].mxu1 }
 0x3c4   :  { %v1446_v57 = vadd.f32 %v1510_v61, %v1445_v52 }
 0x3c5   :  { %1485 = vst [vmem:[#allocation10 + $0x58] sm:$0xff] %v1451_v14 }
 0x3c6   :  { %1484 = vst [vmem:[#allocation10 + $0x50] sm:$0xff] %v1446_v57 }
 0x3ca   :  { %v1675_v58 = vpop.f32.mrb[76].mxu1 }
 0x3cb   :  { %v1461_v15 = vadd.f32 %v1675_v58, %v1510_v61  ;;  %v1455_v1 = vpop.f32.mrb[77].mxu1 }
 0x3cc   :  { %v1456_v53 = vadd.f32 %v1510_v61, %v1455_v1 }
 0x3cd   :  { %1487 = vst [vmem:[#allocation10 + $0x68] sm:$0xff] %v1461_v15 }
 0x3ce   :  { %1486 = vst [vmem:[#allocation10 + $0x60] sm:$0xff] %v1456_v53 }
 0x3d2   :  { %v1678_v16 = vpop.f32.mrb[78].mxu1 }
 0x3d3   :  { %v1471_v17 = vadd.f32 %v1678_v16, %v1510_v61  ;;  %v1465_v54 = vpop.f32.mrb[79].mxu1 }
 0x3d4   :  { %v1466_v19 = vadd.f32 %v1510_v61, %v1465_v54 }
 0x3d5   :  { %1489 = vst [vmem:[#allocation10 + $0x78] sm:$0xff] %v1471_v17 }
 0x3d6   :  { %1488 = vst [vmem:[#allocation10 + $0x70] sm:$0xff] %v1466_v19 }
 0x3d7   :  { %2206 = shalt.err (!%p2203_p8)
}
 0x3d8   :  { %s2207_s12 = scalar_lea.hbm %s2494_s7, 2048 }
 0x3d9   :  { %p2208_p9 = scmp.ne.s32.totalorder %s2494_s7, %s2207_s12  ;;  %p2211_p10 = scmp.lt.u32.totalorder %s2207_s12, %s2494_s7 }
 0x3db   :  { %p2213_p11 = pnand %p2211_p10, %p2208_p9 }
 0x3dd   :  { %2216 = shalt.err (!%p2213_p11)
}
 0x3de   :  { %1501 = dma.vmem_to_hbm [thread:$0]  %s1496_s8, 2048, %s2494_s7, [#allocation4], %s2232_s0, %s2232_s0, %s2233_s15  }
 0x3df   :  { %2223 = dma.done.wait [#allocation4], 2048  }
 0x3e0   :  { %2224 = vsyncadd [#allocation4], 4294965248 }
 0x3e1   :  { %1505 = vsyncpa [#allocation3], 1 }
 0x3e2   :  { %1506 = vsyncpa [#allocation6], 1 }
 0x3e3   :  { %1507 = vsyncpa [#allocation9], 1 }
 0x3e4   :  { %1508 = vsyncpa [#allocation4], 1 }

</bundles_post_ra>
